<compile_context>
chip_gen: v5e
topology: v5e:2x2
jax: 0.10.0
libtpu: 0.0.40
codegen_flags: <defaults>
</compile_context>

<pallas_src>
import functools
import math

import jax
import jax.numpy as jnp
from jax.experimental import pallas as pl
from jax.experimental.pallas import tpu as pltpu

VMEM = pl.BlockSpec(memory_space=pltpu.MemorySpace.VMEM)
SMEM = pl.BlockSpec(memory_space=pltpu.MemorySpace.SMEM)


def _leaky(y):
    # nn.LeakyReLU(negative_slope=0.1) as in the reference module.
    return jnp.where(y > 0, y, 0.1 * y)


def _layer_norm(x, gamma, beta, eps=1e-5):
    mean = jnp.mean(x, axis=-1, keepdims=True)
    var = jnp.mean(jnp.square(x - mean), axis=-1, keepdims=True)
    return (x - mean) * jax.lax.rsqrt(var + eps) * gamma + beta


# --------------------------------------------------------------------------
# Fused forward kernel: node encoder + num_layer GIN layers + virtual node
# --------------------------------------------------------------------------

def _fused_gnn_kernel(
    # inputs
    x_ref, eattr_ref, batch_ref, src_ref, dst_ref, eps_ref,
    wenc1_ref, benc1_ref, wenc2_ref, benc2_ref,
    we_ref, be_ref, w1_ref, b1_ref, w2_ref, b2_ref, lng_ref, lnb_ref,
    wv1_ref, bv1_ref, wv2_ref, bv2_ref,
    # output (JK='concat' slab)
    out_ref,
    # VMEM scratch
    h_ref, eemb_ref, aggr_ref,
    *, num_layer, num_graphs, emb_dim,
):
    f32 = jnp.float32
    N = x_ref.shape[0]
    E = eattr_ref.shape[0]
    D = emb_dim
    G = num_graphs

    batch_ids = batch_ref[...]                                     # (N, 1) int32
    graph_masks = [(batch_ids == g).astype(f32) for g in range(G)]  # each (N, 1)

    # ---- node encoder: Linear -> LeakyReLU -> Linear -> LeakyReLU ----------
    h = _leaky(jnp.dot(x_ref[...], wenc1_ref[...],
                       preferred_element_type=f32) + benc1_ref[...])
    h = _leaky(jnp.dot(h, wenc2_ref[...],
                       preferred_element_type=f32) + benc2_ref[...])

    # virtual-node embedding initialized to zero (torch.nn.init.constant_(..., 0))
    vn = jnp.zeros((G, D), f32)

    for layer in range(num_layer):
        # ---- h_in = h + vn[batch]  (G-way VPU broadcast-select, no MXU) ----
        vnb = jnp.zeros((N, D), f32)
        for g in range(G):
            vnb = vnb + graph_masks[g] * vn[g:g + 1, :]
        h_in = h + vnb

        # h_list[layer] (post vn-add) goes into column block `layer` of the slab
        out_ref[:, layer * D:(layer + 1) * D] = h_in
        h_ref[...] = h_in                         # VMEM copy for row gathers

        # ---- GINConv ---------------------------------------------------------
        # edge encoder: relu(edge_attr @ We + be), all edges at once (MXU)
        eemb_ref[...] = jnp.maximum(
            jnp.dot(eattr_ref[...], we_ref[layer],
                    preferred_element_type=f32) + be_ref[layer], 0.0)

        # aggr[dst] += relu(h_in[src] + edge_emb)  -- index-driven gather/scatter
        aggr_ref[...] = jnp.zeros_like(aggr_ref)

        def edge_body(e, carry):
            s = src_ref[e]
            d = dst_ref[e]
            msg = jnp.maximum(
                h_ref[pl.ds(s, 1), :] + eemb_ref[pl.ds(e, 1), :], 0.0)
            aggr_ref[pl.ds(d, 1), :] = aggr_ref[pl.ds(d, 1), :] + msg
            return carry

        jax.lax.fori_loop(0, E, edge_body, 0)

        # GIN MLP (BatchNorm folded into W1/b1 at init): two MXU matmuls
        eps_gin = eps_ref[layer]
        z = (1.0 + eps_gin) * h_in + aggr_ref[...]
        h1 = jnp.maximum(
            jnp.dot(z, w1_ref[layer], preferred_element_type=f32) + b1_ref[layer],
            0.0)
        h_conv = jnp.dot(h1, w2_ref[layer],
                         preferred_element_type=f32) + b2_ref[layer]

        # ---- LayerNorm -> LeakyReLU(0.1) -> residual ---------------------------
        h = _leaky(_layer_norm(h_conv, lng_ref[layer], lnb_ref[layer])) + h_in

        # ---- virtual-node update (mean pool + 2-layer MLP, residual) -----------
        if layer < num_layer - 1:
            pooled = jnp.zeros((G, D), f32)
            for g in range(G):
                cnt = jnp.maximum(jnp.sum(graph_masks[g]), 1.0)
                mean_g = jnp.sum(graph_masks[g] * h_in, axis=0,
                                 keepdims=True) / cnt                 # (1, D)
                sel = (jax.lax.broadcasted_iota(jnp.int32, (G, 1), 0)
                       == g).astype(f32)                              # (G, 1)
                pooled = pooled + sel * mean_g
            v_tmp = pooled + vn
            dvn = _leaky(jnp.dot(v_tmp, wv1_ref[layer],
                                 preferred_element_type=f32) + bv1_ref[layer])
            dvn = _leaky(jnp.dot(dvn, wv2_ref[layer],
                                 preferred_element_type=f32) + bv2_ref[layer])
            vn = vn + dvn                                             # residual

    # final layer output -> last column block of the JK-concat slab
    out_ref[:, num_layer * D:(num_layer + 1) * D] = h


# --------------------------------------------------------------------------
# Host wrapper
# --------------------------------------------------------------------------

def gnn_node_virtualnode_forward(params, x, edge_index, edge_attr, batch,
                                 num_graphs, num_layer, emb_dim):
    N = x.shape[0]
    E = edge_attr.shape[0]
    D = emb_dim

    src = edge_index[0].astype(jnp.int32)
    dst = edge_index[1].astype(jnp.int32)
    batch_ids = batch.astype(jnp.int32).reshape(N, 1)

    convs = params["convs"]
    norms = params["norms"]
    vmlps = params["vn_mlps"]

    we = jnp.stack([c["We"] for c in convs])                       # (L, edim, D)
    be = jnp.stack([c["be"].reshape(1, D) for c in convs])         # (L, 1, D)
    w1 = jnp.stack([c["W1"] for c in convs])                       # (L, D, 2D) BN-folded
    b1 = jnp.stack([c["b1"].reshape(1, 2 * D) for c in convs])     # (L, 1, 2D)
    w2 = jnp.stack([c["W2"] for c in convs])                       # (L, 2D, D)
    b2 = jnp.stack([c["b2"].reshape(1, D) for c in convs])         # (L, 1, D)
    eps = jnp.stack([c["eps"] for c in convs]).astype(jnp.float32)  # (L,)
    lng = jnp.stack([n["gamma"].reshape(1, D) for n in norms])     # (L, 1, D)
    lnb = jnp.stack([n["beta"].reshape(1, D) for n in norms])      # (L, 1, D)

    wv1 = jnp.stack([m["W1"] for m in vmlps])                      # (L-1, D, 2D)
    bv1 = jnp.stack([m["b1"].reshape(1, 2 * D) for m in vmlps])    # (L-1, 1, 2D)
    wv2 = jnp.stack([m["W2"] for m in vmlps])                      # (L-1, 2D, D)
    bv2 = jnp.stack([m["b2"].reshape(1, D) for m in vmlps])        # (L-1, 1, D)

    wenc1, benc1 = params["enc1"]
    wenc2, benc2 = params["enc2"]

    kernel = functools.partial(
        _fused_gnn_kernel,
        num_layer=num_layer, num_graphs=num_graphs, emb_dim=emb_dim)

    return pl.pallas_call(
        kernel,
        out_shape=jax.ShapeDtypeStruct((N, (num_layer + 1) * D), jnp.float32),
        in_specs=[VMEM, VMEM, VMEM, SMEM, SMEM, SMEM] + [VMEM] * 16,
        out_specs=VMEM,
        scratch_shapes=[
            pltpu.VMEM((N, D), jnp.float32),     # h_in, resident for row gathers
            pltpu.VMEM((E, D), jnp.float32),     # edge embeddings
            pltpu.VMEM((N, D), jnp.float32),     # scatter-add accumulator
        ],
    )(x, edge_attr, batch_ids, src, dst, eps,
      wenc1, benc1.reshape(1, 2 * D), wenc2, benc2.reshape(1, D),
      we, be, w1, b1, w2, b2, lng, lnb,
      wv1, bv1, wv2, bv2)


# --------------------------------------------------------------------------
# Parameter init (torch.nn.Linear-style uniform init; BN folded at init time)
# --------------------------------------------------------------------------

def _init_linear(key, fan_in, fan_out):
    k1, k2 = jax.random.split(key)
    bound = 1.0 / math.sqrt(fan_in)
    w = jax.random.uniform(k1, (fan_in, fan_out), jnp.float32, -bound, bound)
    b = jax.random.uniform(k2, (fan_out,), jnp.float32, -bound, bound)
    return w, b


def init_params(key, node_dim, edge_dim, emb_dim, num_layer):
    keys = iter(jax.random.split(key, 2 + 3 * num_layer + 2 * (num_layer - 1)))
    params = {"convs": [], "norms": [], "vn_mlps": []}
    params["enc1"] = _init_linear(next(keys), node_dim, 2 * emb_dim)
    params["enc2"] = _init_linear(next(keys), 2 * emb_dim, emb_dim)
    bn_eps = 1e-5
    for _ in range(num_layer):
        we, be = _init_linear(next(keys), edge_dim, emb_dim)
        w1, b1 = _init_linear(next(keys), emb_dim, 2 * emb_dim)
        w2, b2 = _init_linear(next(keys), 2 * emb_dim, emb_dim)
        # BatchNorm1d(2*emb_dim) eval mode: running_mean=0, running_var=1,
        # gamma=1, beta=0 -> fold scale/shift into (W1, b1).
        bn_scale = jnp.ones((2 * emb_dim,), jnp.float32) / jnp.sqrt(1.0 + bn_eps)
        bn_shift = jnp.zeros((2 * emb_dim,), jnp.float32)
        params["convs"].append(dict(
            We=we, be=be,
            W1=w1 * bn_scale[None, :], b1=b1 * bn_scale + bn_shift,
            W2=w2, b2=b2,
            eps=jnp.zeros((), jnp.float32),            # GIN eps init = 0
        ))
        params["norms"].append(dict(
            gamma=jnp.ones((emb_dim,), jnp.float32),
            beta=jnp.zeros((emb_dim,), jnp.float32)))
    for _ in range(num_layer - 1):
        w1, b1 = _init_linear(next(keys), emb_dim, 2 * emb_dim)
        w2, b2 = _init_linear(next(keys), 2 * emb_dim, emb_dim)
        params["vn_mlps"].append(dict(W1=w1, b1=b1, W2=w2, b2=b2))
    return params


# --------------------------------------------------------------------------
# Pure-JAX reference (same eval-mode-BN folded semantics) for a sanity check
# --------------------------------------------------------------------------

def _reference_forward(params, x, edge_index, edge_attr, batch,
                       num_graphs, num_layer, emb_dim):
    def leaky(v):
        return jnp.where(v > 0, v, 0.1 * v)

    with jax.default_matmul_precision("highest"):
        src, dst = edge_index[0], edge_index[1]
        N = x.shape[0]
        h = leaky(x @ params["enc1"][0] + params["enc1"][1])
        h = leaky(h @ params["enc2"][0] + params["enc2"][1])
        h_list = [h]
        vn = jnp.zeros((num_graphs, emb_dim), jnp.float32)
        for layer in range(num_layer):
            h_in = h_list[layer] + vn[batch]
            h_list[layer] = h_in
            c = params["convs"][layer]
            eemb = jax.nn.relu(edge_attr @ c["We"] + c["be"])
            msg = jax.nn.relu(h_in[src] + eemb)
            aggr = jax.ops.segment_sum(msg, dst, num_segments=N)
            z = (1.0 + c["eps"]) * h_in + aggr
            h1 = jax.nn.relu(z @ c["W1"] + c["b1"])
            h_conv = h1 @ c["W2"] + c["b2"]
            n = params["norms"][layer]
            mean = jnp.mean(h_conv, axis=-1, keepdims=True)
            var = jnp.mean((h_conv - mean) ** 2, axis=-1, keepdims=True)
            y = (h_conv - mean) / jnp.sqrt(var + 1e-5) * n["gamma"] + n["beta"]
            h_out = leaky(y) + h_in
            h_list.append(h_out)
            if layer < num_layer - 1:
                ones = jnp.ones((N,), jnp.float32)
                cnt = jnp.maximum(
                    jax.ops.segment_sum(ones, batch, num_segments=num_graphs), 1.0)
                pooled = jax.ops.segment_sum(
                    h_in, batch, num_segments=num_graphs) / cnt[:, None]
                m = params["vn_mlps"][layer]
                v_tmp = pooled + vn
                d = leaky(v_tmp @ m["W1"] + m["b1"])
                d = leaky(d @ m["W2"] + m["b2"])
                vn = vn + d
        return jnp.concatenate(h_list, axis=1)


# --------------------------------------------------------------------------

if __name__ == "__main__":
    N_NODES = 32
    N_EDGES = 64
    NODE_DIM = 16
    EDGE_DIM = 8
    EMB_DIM = 32
    NUM_GRAPHS = 2
    NUM_LAYER = 2

    key = jax.random.PRNGKey(0)
    k_x, k_e, k_src, k_dst, k_p = jax.random.split(key, 5)

    x = jax.random.normal(k_x, (N_NODES, NODE_DIM), jnp.float32)
    edge_attr = jax.random.normal(k_e, (N_EDGES, EDGE_DIM), jnp.float32)
    src = jax.random.randint(k_src, (N_EDGES,), 0, N_NODES, jnp.int32)
    dst = jax.random.randint(k_dst, (N_EDGES,), 0, N_NODES, jnp.int32)
    edge_index = jnp.stack([src, dst], axis=0)
    batch = jnp.concatenate([
        jnp.zeros((N_NODES // 2,), jnp.int32),
        jnp.ones((N_NODES - N_NODES // 2,), jnp.int32)])

    params = init_params(k_p, NODE_DIM, EDGE_DIM, EMB_DIM, NUM_LAYER)

    fwd = jax.jit(functools.partial(
        gnn_node_virtualnode_forward,
        num_graphs=NUM_GRAPHS, num_layer=NUM_LAYER, emb_dim=EMB_DIM))
    out = jax.block_until_ready(fwd(params, x, edge_index, edge_attr, batch))

    expected_shape = (N_NODES, (NUM_LAYER + 1) * EMB_DIM)   # JK='concat'
    assert out.shape == expected_shape, (out.shape, expected_shape)
    assert bool(jnp.all(jnp.isfinite(out)))

    ref = _reference_forward(params, x, edge_index, edge_attr, batch,
                             NUM_GRAPHS, NUM_LAYER, EMB_DIM)
    max_err = float(jnp.max(jnp.abs(out - ref)))
    assert max_err < 5e-2, f"max abs error vs reference = {max_err}"

    print("KERNEL_OK")
</pallas_src>

<mosaic_0001>
module attributes {stable_mosaic.version = 11 : i64} {
  func.func @_fused_gnn_kernel(%arg0: memref<32x16xf32, #tpu.memory_space<vmem>>, %arg1: memref<64x8xf32, #tpu.memory_space<vmem>>, %arg2: memref<32x1xi32, #tpu.memory_space<vmem>>, %arg3: memref<64xi32, #tpu.memory_space<smem>>, %arg4: memref<64xi32, #tpu.memory_space<smem>>, %arg5: memref<2xf32, #tpu.memory_space<smem>>, %arg6: memref<16x64xf32, #tpu.memory_space<vmem>>, %arg7: memref<1x64xf32, #tpu.memory_space<vmem>>, %arg8: memref<64x32xf32, #tpu.memory_space<vmem>>, %arg9: memref<1x32xf32, #tpu.memory_space<vmem>>, %arg10: memref<2x8x32xf32, #tpu.memory_space<vmem>>, %arg11: memref<2x1x32xf32, #tpu.memory_space<vmem>>, %arg12: memref<2x32x64xf32, #tpu.memory_space<vmem>>, %arg13: memref<2x1x64xf32, #tpu.memory_space<vmem>>, %arg14: memref<2x64x32xf32, #tpu.memory_space<vmem>>, %arg15: memref<2x1x32xf32, #tpu.memory_space<vmem>>, %arg16: memref<2x1x32xf32, #tpu.memory_space<vmem>>, %arg17: memref<2x1x32xf32, #tpu.memory_space<vmem>>, %arg18: memref<1x32x64xf32, #tpu.memory_space<vmem>>, %arg19: memref<1x1x64xf32, #tpu.memory_space<vmem>>, %arg20: memref<1x64x32xf32, #tpu.memory_space<vmem>>, %arg21: memref<1x1x32xf32, #tpu.memory_space<vmem>>, %arg22: memref<32x96xf32, #tpu.memory_space<vmem>>, %arg23: memref<32x32xf32, #tpu.memory_space<vmem>>, %arg24: memref<64x32xf32, #tpu.memory_space<vmem>>, %arg25: memref<32x32xf32, #tpu.memory_space<vmem>>) attributes {dimension_semantics = [], scalar_prefetch = 0 : i64, scratch_operands = 3 : i64, tpu.core_type = #tpu.core_type<tc>} {
    %c0 = arith.constant 0 : index
    %c0_0 = arith.constant 0 : index
    %0 = vector.load %arg2[%c0, %c0_0] : memref<32x1xi32, #tpu.memory_space<vmem>>, vector<32x1xi32>
    %c0_i32 = arith.constant 0 : i32
    %1 = vector.broadcast %c0_i32 : i32 to vector<32x1xi32>
    %2 = arith.cmpi eq, %0, %1 : vector<32x1xi32>
    %3 = arith.extui %2 : vector<32x1xi1> to vector<32x1xi32>
    %4 = arith.sitofp %3 : vector<32x1xi32> to vector<32x1xf32>
    %c1_i32 = arith.constant 1 : i32
    %5 = vector.broadcast %c1_i32 : i32 to vector<32x1xi32>
    %6 = arith.cmpi eq, %0, %5 : vector<32x1xi32>
    %7 = arith.extui %6 : vector<32x1xi1> to vector<32x1xi32>
    %8 = arith.sitofp %7 : vector<32x1xi32> to vector<32x1xf32>
    %c0_1 = arith.constant 0 : index
    %c0_2 = arith.constant 0 : index
    %9 = vector.load %arg0[%c0_1, %c0_2] : memref<32x16xf32, #tpu.memory_space<vmem>>, vector<32x16xf32>
    %c0_3 = arith.constant 0 : index
    %c0_4 = arith.constant 0 : index
    %10 = vector.load %arg6[%c0_3, %c0_4] : memref<16x64xf32, #tpu.memory_space<vmem>>, vector<16x64xf32>
    %cst = arith.constant dense<0.000000e+00> : vector<32x64xf32>
    %11 = tpu.matmul %9, %10, %cst {dimension_numbers = #tpu.dot_dimension_numbers<[1], [0], [0], [1], [0, 0, 1, 1], [], []>} : vector<32x16xf32>, vector<16x64xf32>, vector<32x64xf32> -> vector<32x64xf32>
    %c0_5 = arith.constant 0 : index
    %c0_6 = arith.constant 0 : index
    %12 = vector.load %arg7[%c0_5, %c0_6] : memref<1x64xf32, #tpu.memory_space<vmem>>, vector<1x64xf32>
    %13 = vector.broadcast %12 : vector<1x64xf32> to vector<32x64xf32>
    %14 = arith.addf %11, %13 : vector<32x64xf32>
    %cst_7 = arith.constant 0.000000e+00 : f32
    %15 = vector.broadcast %cst_7 : f32 to vector<32x64xf32>
    %16 = arith.cmpf ogt, %14, %15 : vector<32x64xf32>
    %cst_8 = arith.constant 1.000000e-01 : f32
    %17 = vector.broadcast %cst_8 : f32 to vector<32x64xf32>
    %18 = arith.mulf %17, %14 : vector<32x64xf32>
    %19 = arith.select %16, %14, %18 : vector<32x64xi1>, vector<32x64xf32>
    %c0_9 = arith.constant 0 : index
    %c0_10 = arith.constant 0 : index
    %20 = vector.load %arg8[%c0_9, %c0_10] : memref<64x32xf32, #tpu.memory_space<vmem>>, vector<64x32xf32>
    %cst_11 = arith.constant dense<0.000000e+00> : vector<32x32xf32>
    %21 = tpu.matmul %19, %20, %cst_11 {dimension_numbers = #tpu.dot_dimension_numbers<[1], [0], [0], [1], [0, 0, 1, 1], [], []>} : vector<32x64xf32>, vector<64x32xf32>, vector<32x32xf32> -> vector<32x32xf32>
    %c0_12 = arith.constant 0 : index
    %c0_13 = arith.constant 0 : index
    %22 = vector.load %arg9[%c0_12, %c0_13] : memref<1x32xf32, #tpu.memory_space<vmem>>, vector<1x32xf32>
    %23 = vector.broadcast %22 : vector<1x32xf32> to vector<32x32xf32>
    %24 = arith.addf %21, %23 : vector<32x32xf32>
    %cst_14 = arith.constant 0.000000e+00 : f32
    %25 = vector.broadcast %cst_14 : f32 to vector<32x32xf32>
    %26 = arith.cmpf ogt, %24, %25 : vector<32x32xf32>
    %cst_15 = arith.constant 1.000000e-01 : f32
    %27 = vector.broadcast %cst_15 : f32 to vector<32x32xf32>
    %28 = arith.mulf %27, %24 : vector<32x32xf32>
    %29 = arith.select %26, %24, %28 : vector<32x32xi1>, vector<32x32xf32>
    %cst_16 = arith.constant 0.000000e+00 : f32
    %30 = vector.broadcast %cst_16 : f32 to vector<2x32xf32>
    %cst_17 = arith.constant 0.000000e+00 : f32
    %31 = vector.broadcast %cst_17 : f32 to vector<32x32xf32>
    %32 = vector.extract_strided_slice %30 {offsets = [0, 0], sizes = [1, 32], strides = [1, 1]} : vector<2x32xf32> to vector<1x32xf32>
    %33 = vector.broadcast %4 : vector<32x1xf32> to vector<32x32xf32>
    %34 = vector.broadcast %32 : vector<1x32xf32> to vector<32x32xf32>
    %35 = arith.mulf %33, %34 : vector<32x32xf32>
    %36 = arith.addf %31, %35 : vector<32x32xf32>
    %37 = vector.extract_strided_slice %30 {offsets = [1, 0], sizes = [1, 32], strides = [1, 1]} : vector<2x32xf32> to vector<1x32xf32>
    %38 = vector.broadcast %8 : vector<32x1xf32> to vector<32x32xf32>
    %39 = vector.broadcast %37 : vector<1x32xf32> to vector<32x32xf32>
    %40 = arith.mulf %38, %39 : vector<32x32xf32>
    %41 = arith.addf %36, %40 : vector<32x32xf32>
    %42 = arith.addf %29, %41 : vector<32x32xf32>
    %c0_18 = arith.constant 0 : index
    %c0_19 = arith.constant 0 : index
    %43 = vector.load %arg22[%c0_18, %c0_19] : memref<32x96xf32, #tpu.memory_space<vmem>>, vector<32x32xf32>
    tpu.vector_store %arg22[%c0_18, %c0_19], %42 {strides = array<i32>} : memref<32x96xf32, #tpu.memory_space<vmem>>, vector<32x32xf32>,
    %c0_20 = arith.constant 0 : index
    %c0_21 = arith.constant 0 : index
    %44 = vector.load %arg23[%c0_20, %c0_21] : memref<32x32xf32, #tpu.memory_space<vmem>>, vector<32x32xf32>
    tpu.vector_store %arg23[%c0_20, %c0_21], %42 {strides = array<i32>} : memref<32x32xf32, #tpu.memory_space<vmem>>, vector<32x32xf32>,
    %c0_22 = arith.constant 0 : index
    %c0_23 = arith.constant 0 : index
    %45 = vector.load %arg1[%c0_22, %c0_23] : memref<64x8xf32, #tpu.memory_space<vmem>>, vector<64x8xf32>
    %c0_24 = arith.constant 0 : index
    %c0_25 = arith.constant 0 : index
    %c0_26 = arith.constant 0 : index
    %46 = vector.load %arg10[%c0_24, %c0_25, %c0_26] : memref<2x8x32xf32, #tpu.memory_space<vmem>>, vector<1x8x32xf32>
    %47 = vector.shape_cast %46 : vector<1x8x32xf32> to vector<8x32xf32>
    %cst_27 = arith.constant dense<0.000000e+00> : vector<64x32xf32>
    %48 = tpu.matmul %45, %47, %cst_27 {dimension_numbers = #tpu.dot_dimension_numbers<[1], [0], [0], [1], [0, 0, 1, 1], [], []>} : vector<64x8xf32>, vector<8x32xf32>, vector<64x32xf32> -> vector<64x32xf32>
    %c0_28 = arith.constant 0 : index
    %c0_29 = arith.constant 0 : index
    %c0_30 = arith.constant 0 : index
    %49 = vector.load %arg11[%c0_28, %c0_29, %c0_30] : memref<2x1x32xf32, #tpu.memory_space<vmem>>, vector<1x1x32xf32>
    %50 = vector.shape_cast %49 : vector<1x1x32xf32> to vector<1x32xf32>
    %51 = vector.broadcast %50 : vector<1x32xf32> to vector<64x32xf32>
    %52 = arith.addf %48, %51 : vector<64x32xf32>
    %cst_31 = arith.constant 0.000000e+00 : f32
    %53 = vector.broadcast %cst_31 : f32 to vector<64x32xf32>
    %54 = arith.maximumf %52, %53 : vector<64x32xf32>
    %c0_32 = arith.constant 0 : index
    %c0_33 = arith.constant 0 : index
    %55 = vector.load %arg24[%c0_32, %c0_33] : memref<64x32xf32, #tpu.memory_space<vmem>>, vector<64x32xf32>
    tpu.vector_store %arg24[%c0_32, %c0_33], %54 {strides = array<i32>} : memref<64x32xf32, #tpu.memory_space<vmem>>, vector<64x32xf32>,
    %cst_34 = arith.constant 0.000000e+00 : f32
    %56 = vector.broadcast %cst_34 : f32 to vector<32x32xf32>
    %c0_35 = arith.constant 0 : index
    %c0_36 = arith.constant 0 : index
    %57 = vector.load %arg25[%c0_35, %c0_36] : memref<32x32xf32, #tpu.memory_space<vmem>>, vector<32x32xf32>
    tpu.vector_store %arg25[%c0_35, %c0_36], %56 {strides = array<i32>} : memref<32x32xf32, #tpu.memory_space<vmem>>, vector<32x32xf32>,
    %c0_i32_37 = arith.constant 0 : i32
    %c64_i32 = arith.constant 64 : i32
    %58 = arith.addi %c0_i32_37, %c64_i32 : i32
    %c1_i32_38 = arith.constant 1 : i32
    scf.for %arg26 = %c0_i32_37 to %58 step %c1_i32_38  : i32 {
      %263 = arith.index_cast %arg26 : i32 to index
      %264 = memref.load %arg3[%263] : memref<64xi32, #tpu.memory_space<smem>>
      %265 = arith.index_cast %arg26 : i32 to index
      %266 = memref.load %arg4[%265] : memref<64xi32, #tpu.memory_space<smem>>
      %267 = arith.index_cast %264 : i32 to index
      %c0_154 = arith.constant 0 : index
      %268 = vector.load %arg23[%267, %c0_154] : memref<32x32xf32, #tpu.memory_space<vmem>>, vector<1x32xf32>
      %269 = arith.index_cast %arg26 : i32 to index
      %c0_155 = arith.constant 0 : index
      %270 = vector.load %arg24[%269, %c0_155] : memref<64x32xf32, #tpu.memory_space<vmem>>, vector<1x32xf32>
      %271 = arith.addf %268, %270 : vector<1x32xf32>
      %cst_156 = arith.constant 0.000000e+00 : f32
      %272 = vector.broadcast %cst_156 : f32 to vector<1x32xf32>
      %273 = arith.maximumf %271, %272 : vector<1x32xf32>
      %274 = arith.index_cast %266 : i32 to index
      %c0_157 = arith.constant 0 : index
      %275 = vector.load %arg25[%274, %c0_157] : memref<32x32xf32, #tpu.memory_space<vmem>>, vector<1x32xf32>
      %276 = arith.addf %275, %273 : vector<1x32xf32>
      %277 = arith.index_cast %266 : i32 to index
      %c0_158 = arith.constant 0 : index
      %278 = vector.load %arg25[%277, %c0_158] : memref<32x32xf32, #tpu.memory_space<vmem>>, vector<1x32xf32>
      tpu.vector_store %arg25[%277, %c0_158], %276 {strides = array<i32>} : memref<32x32xf32, #tpu.memory_space<vmem>>, vector<1x32xf32>,
    }
    %c64_i32_39 = arith.constant 64 : i32
    %c0_40 = arith.constant 0 : index
    %59 = memref.load %arg5[%c0_40] : memref<2xf32, #tpu.memory_space<smem>>
    %cst_41 = arith.constant 1.000000e+00 : f32
    %60 = arith.addf %cst_41, %59 : f32
    %61 = vector.broadcast %60 : f32 to vector<32x32xf32>
    %62 = arith.mulf %61, %42 : vector<32x32xf32>
    %c0_42 = arith.constant 0 : index
    %c0_43 = arith.constant 0 : index
    %63 = vector.load %arg25[%c0_42, %c0_43] : memref<32x32xf32, #tpu.memory_space<vmem>>, vector<32x32xf32>
    %64 = arith.addf %62, %63 : vector<32x32xf32>
    %c0_44 = arith.constant 0 : index
    %c0_45 = arith.constant 0 : index
    %c0_46 = arith.constant 0 : index
    %65 = vector.load %arg12[%c0_44, %c0_45, %c0_46] : memref<2x32x64xf32, #tpu.memory_space<vmem>>, vector<1x32x64xf32>
    %66 = vector.shape_cast %65 : vector<1x32x64xf32> to vector<32x64xf32>
    %cst_47 = arith.constant dense<0.000000e+00> : vector<32x64xf32>
    %67 = tpu.matmul %64, %66, %cst_47 {dimension_numbers = #tpu.dot_dimension_numbers<[1], [0], [0], [1], [0, 0, 1, 1], [], []>} : vector<32x32xf32>, vector<32x64xf32>, vector<32x64xf32> -> vector<32x64xf32>
    %c0_48 = arith.constant 0 : index
    %c0_49 = arith.constant 0 : index
    %c0_50 = arith.constant 0 : index
    %68 = vector.load %arg13[%c0_48, %c0_49, %c0_50] : memref<2x1x64xf32, #tpu.memory_space<vmem>>, vector<1x1x64xf32>
    %69 = vector.shape_cast %68 : vector<1x1x64xf32> to vector<1x64xf32>
    %70 = vector.broadcast %69 : vector<1x64xf32> to vector<32x64xf32>
    %71 = arith.addf %67, %70 : vector<32x64xf32>
    %cst_51 = arith.constant 0.000000e+00 : f32
    %72 = vector.broadcast %cst_51 : f32 to vector<32x64xf32>
    %73 = arith.maximumf %71, %72 : vector<32x64xf32>
    %c0_52 = arith.constant 0 : index
    %c0_53 = arith.constant 0 : index
    %c0_54 = arith.constant 0 : index
    %74 = vector.load %arg14[%c0_52, %c0_53, %c0_54] : memref<2x64x32xf32, #tpu.memory_space<vmem>>, vector<1x64x32xf32>
    %75 = vector.shape_cast %74 : vector<1x64x32xf32> to vector<64x32xf32>
    %cst_55 = arith.constant dense<0.000000e+00> : vector<32x32xf32>
    %76 = tpu.matmul %73, %75, %cst_55 {dimension_numbers = #tpu.dot_dimension_numbers<[1], [0], [0], [1], [0, 0, 1, 1], [], []>} : vector<32x64xf32>, vector<64x32xf32>, vector<32x32xf32> -> vector<32x32xf32>
    %c0_56 = arith.constant 0 : index
    %c0_57 = arith.constant 0 : index
    %c0_58 = arith.constant 0 : index
    %77 = vector.load %arg15[%c0_56, %c0_57, %c0_58] : memref<2x1x32xf32, #tpu.memory_space<vmem>>, vector<1x1x32xf32>
    %78 = vector.shape_cast %77 : vector<1x1x32xf32> to vector<1x32xf32>
    %79 = vector.broadcast %78 : vector<1x32xf32> to vector<32x32xf32>
    %80 = arith.addf %76, %79 : vector<32x32xf32>
    %c0_59 = arith.constant 0 : index
    %c0_60 = arith.constant 0 : index
    %c0_61 = arith.constant 0 : index
    %81 = vector.load %arg16[%c0_59, %c0_60, %c0_61] : memref<2x1x32xf32, #tpu.memory_space<vmem>>, vector<1x1x32xf32>
    %82 = vector.shape_cast %81 : vector<1x1x32xf32> to vector<1x32xf32>
    %c0_62 = arith.constant 0 : index
    %c0_63 = arith.constant 0 : index
    %c0_64 = arith.constant 0 : index
    %83 = vector.load %arg17[%c0_62, %c0_63, %c0_64] : memref<2x1x32xf32, #tpu.memory_space<vmem>>, vector<1x1x32xf32>
    %84 = vector.shape_cast %83 : vector<1x1x32xf32> to vector<1x32xf32>
    %cst_65 = arith.constant dense<0.000000e+00> : vector<32xf32>
    %85 = vector.multi_reduction <add>, %80, %cst_65 [1] : vector<32x32xf32> to vector<32xf32>
    %86 = vector.shape_cast %85 : vector<32xf32> to vector<32x1xf32>
    %cst_66 = arith.constant 3.200000e+01 : f32
    %87 = vector.broadcast %cst_66 : f32 to vector<32x1xf32>
    %88 = arith.divf %86, %87 : vector<32x1xf32>
    %89 = vector.broadcast %88 : vector<32x1xf32> to vector<32x32xf32>
    %90 = arith.subf %80, %89 : vector<32x32xf32>
    %91 = arith.mulf %90, %90 : vector<32x32xf32>
    %cst_67 = arith.constant dense<0.000000e+00> : vector<32xf32>
    %92 = vector.multi_reduction <add>, %91, %cst_67 [1] : vector<32x32xf32> to vector<32xf32>
    %93 = vector.shape_cast %92 : vector<32xf32> to vector<32x1xf32>
    %cst_68 = arith.constant 3.200000e+01 : f32
    %94 = vector.broadcast %cst_68 : f32 to vector<32x1xf32>
    %95 = arith.divf %93, %94 : vector<32x1xf32>
    %96 = vector.broadcast %88 : vector<32x1xf32> to vector<32x32xf32>
    %97 = arith.subf %80, %96 : vector<32x32xf32>
    %cst_69 = arith.constant 9.99999974E-6 : f32
    %98 = vector.broadcast %cst_69 : f32 to vector<32x1xf32>
    %99 = arith.addf %95, %98 : vector<32x1xf32>
    %100 = math.rsqrt %99 : vector<32x1xf32>
    %101 = vector.broadcast %100 : vector<32x1xf32> to vector<32x32xf32>
    %102 = arith.mulf %97, %101 : vector<32x32xf32>
    %103 = vector.broadcast %82 : vector<1x32xf32> to vector<32x32xf32>
    %104 = arith.mulf %102, %103 : vector<32x32xf32>
    %105 = vector.broadcast %84 : vector<1x32xf32> to vector<32x32xf32>
    %106 = arith.addf %104, %105 : vector<32x32xf32>
    %cst_70 = arith.constant 0.000000e+00 : f32
    %107 = vector.broadcast %cst_70 : f32 to vector<32x32xf32>
    %108 = arith.cmpf ogt, %106, %107 : vector<32x32xf32>
    %cst_71 = arith.constant 1.000000e-01 : f32
    %109 = vector.broadcast %cst_71 : f32 to vector<32x32xf32>
    %110 = arith.mulf %109, %106 : vector<32x32xf32>
    %111 = arith.select %108, %106, %110 : vector<32x32xi1>, vector<32x32xf32>
    %112 = arith.addf %111, %42 : vector<32x32xf32>
    %cst_72 = arith.constant 0.000000e+00 : f32
    %113 = vector.broadcast %cst_72 : f32 to vector<2x32xf32>
    %114 = vector.shape_cast %4 : vector<32x1xf32> to vector<1x32x1xf32>
    %cst_73 = arith.constant dense<0.000000e+00> : vector<1xf32>
    %115 = vector.multi_reduction <add>, %114, %cst_73 [1, 2] : vector<1x32x1xf32> to vector<1xf32>
    %116 = vector.shape_cast %115 : vector<1xf32> to vector<1x1x1xf32>
    %117 = vector.extract %116[0, 0, 0] : f32 from vector<1x1x1xf32>
    %cst_74 = arith.constant 1.000000e+00 : f32
    %118 = arith.maximumf %117, %cst_74 : f32
    %119 = vector.broadcast %4 : vector<32x1xf32> to vector<32x32xf32>
    %120 = arith.mulf %119, %42 : vector<32x32xf32>
    %cst_75 = arith.constant dense<0.000000e+00> : vector<32xf32>
    %121 = vector.multi_reduction <add>, %120, %cst_75 [0] : vector<32x32xf32> to vector<32xf32>
    %122 = vector.shape_cast %121 : vector<32xf32> to vector<1x32xf32>
    %123 = vector.broadcast %118 : f32 to vector<1x32xf32>
    %124 = arith.divf %122, %123 : vector<1x32xf32>
    %125 = tpu.iota {dimensions = array<i32: 0>} : vector<2x1xi32>
    %c0_i32_76 = arith.constant 0 : i32
    %126 = vector.broadcast %c0_i32_76 : i32 to vector<2x1xi32>
    %127 = arith.cmpi eq, %125, %126 : vector<2x1xi32>
    %128 = arith.extui %127 : vector<2x1xi1> to vector<2x1xi32>
    %129 = arith.sitofp %128 : vector<2x1xi32> to vector<2x1xf32>
    %130 = vector.broadcast %129 : vector<2x1xf32> to vector<2x32xf32>
    %131 = vector.broadcast %124 : vector<1x32xf32> to vector<2x32xf32>
    %132 = arith.mulf %130, %131 : vector<2x32xf32>
    %133 = arith.addf %113, %132 : vector<2x32xf32>
    %134 = vector.shape_cast %8 : vector<32x1xf32> to vector<1x32x1xf32>
    %cst_77 = arith.constant dense<0.000000e+00> : vector<1xf32>
    %135 = vector.multi_reduction <add>, %134, %cst_77 [1, 2] : vector<1x32x1xf32> to vector<1xf32>
    %136 = vector.shape_cast %135 : vector<1xf32> to vector<1x1x1xf32>
    %137 = vector.extract %136[0, 0, 0] : f32 from vector<1x1x1xf32>
    %cst_78 = arith.constant 1.000000e+00 : f32
    %138 = arith.maximumf %137, %cst_78 : f32
    %139 = vector.broadcast %8 : vector<32x1xf32> to vector<32x32xf32>
    %140 = arith.mulf %139, %42 : vector<32x32xf32>
    %cst_79 = arith.constant dense<0.000000e+00> : vector<32xf32>
    %141 = vector.multi_reduction <add>, %140, %cst_79 [0] : vector<32x32xf32> to vector<32xf32>
    %142 = vector.shape_cast %141 : vector<32xf32> to vector<1x32xf32>
    %143 = vector.broadcast %138 : f32 to vector<1x32xf32>
    %144 = arith.divf %142, %143 : vector<1x32xf32>
    %145 = tpu.iota {dimensions = array<i32: 0>} : vector<2x1xi32>
    %c1_i32_80 = arith.constant 1 : i32
    %146 = vector.broadcast %c1_i32_80 : i32 to vector<2x1xi32>
    %147 = arith.cmpi eq, %145, %146 : vector<2x1xi32>
    %148 = arith.extui %147 : vector<2x1xi1> to vector<2x1xi32>
    %149 = arith.sitofp %148 : vector<2x1xi32> to vector<2x1xf32>
    %150 = vector.broadcast %149 : vector<2x1xf32> to vector<2x32xf32>
    %151 = vector.broadcast %144 : vector<1x32xf32> to vector<2x32xf32>
    %152 = arith.mulf %150, %151 : vector<2x32xf32>
    %153 = arith.addf %133, %152 : vector<2x32xf32>
    %154 = arith.addf %153, %30 : vector<2x32xf32>
    %c0_81 = arith.constant 0 : index
    %c0_82 = arith.constant 0 : index
    %c0_83 = arith.constant 0 : index
    %155 = vector.load %arg18[%c0_81, %c0_82, %c0_83] : memref<1x32x64xf32, #tpu.memory_space<vmem>>, vector<1x32x64xf32>
    %156 = vector.shape_cast %155 : vector<1x32x64xf32> to vector<32x64xf32>
    %cst_84 = arith.constant dense<0.000000e+00> : vector<2x64xf32>
    %157 = tpu.matmul %154, %156, %cst_84 {dimension_numbers = #tpu.dot_dimension_numbers<[1], [0], [0], [1], [0, 0, 1, 1], [], []>} : vector<2x32xf32>, vector<32x64xf32>, vector<2x64xf32> -> vector<2x64xf32>
    %c0_85 = arith.constant 0 : index
    %c0_86 = arith.constant 0 : index
    %c0_87 = arith.constant 0 : index
    %158 = vector.load %arg19[%c0_85, %c0_86, %c0_87] : memref<1x1x64xf32, #tpu.memory_space<vmem>>, vector<1x1x64xf32>
    %159 = vector.shape_cast %158 : vector<1x1x64xf32> to vector<1x64xf32>
    %160 = vector.broadcast %159 : vector<1x64xf32> to vector<2x64xf32>
    %161 = arith.addf %157, %160 : vector<2x64xf32>
    %cst_88 = arith.constant 0.000000e+00 : f32
    %162 = vector.broadcast %cst_88 : f32 to vector<2x64xf32>
    %163 = arith.cmpf ogt, %161, %162 : vector<2x64xf32>
    %cst_89 = arith.constant 1.000000e-01 : f32
    %164 = vector.broadcast %cst_89 : f32 to vector<2x64xf32>
    %165 = arith.mulf %164, %161 : vector<2x64xf32>
    %166 = arith.select %163, %161, %165 : vector<2x64xi1>, vector<2x64xf32>
    %c0_90 = arith.constant 0 : index
    %c0_91 = arith.constant 0 : index
    %c0_92 = arith.constant 0 : index
    %167 = vector.load %arg20[%c0_90, %c0_91, %c0_92] : memref<1x64x32xf32, #tpu.memory_space<vmem>>, vector<1x64x32xf32>
    %168 = vector.shape_cast %167 : vector<1x64x32xf32> to vector<64x32xf32>
    %cst_93 = arith.constant dense<0.000000e+00> : vector<2x32xf32>
    %169 = tpu.matmul %166, %168, %cst_93 {dimension_numbers = #tpu.dot_dimension_numbers<[1], [0], [0], [1], [0, 0, 1, 1], [], []>} : vector<2x64xf32>, vector<64x32xf32>, vector<2x32xf32> -> vector<2x32xf32>
    %c0_94 = arith.constant 0 : index
    %c0_95 = arith.constant 0 : index
    %c0_96 = arith.constant 0 : index
    %170 = vector.load %arg21[%c0_94, %c0_95, %c0_96] : memref<1x1x32xf32, #tpu.memory_space<vmem>>, vector<1x1x32xf32>
    %171 = vector.shape_cast %170 : vector<1x1x32xf32> to vector<1x32xf32>
    %172 = vector.broadcast %171 : vector<1x32xf32> to vector<2x32xf32>
    %173 = arith.addf %169, %172 : vector<2x32xf32>
    %cst_97 = arith.constant 0.000000e+00 : f32
    %174 = vector.broadcast %cst_97 : f32 to vector<2x32xf32>
    %175 = arith.cmpf ogt, %173, %174 : vector<2x32xf32>
    %cst_98 = arith.constant 1.000000e-01 : f32
    %176 = vector.broadcast %cst_98 : f32 to vector<2x32xf32>
    %177 = arith.mulf %176, %173 : vector<2x32xf32>
    %178 = arith.select %175, %173, %177 : vector<2x32xi1>, vector<2x32xf32>
    %179 = arith.addf %30, %178 : vector<2x32xf32>
    %cst_99 = arith.constant 0.000000e+00 : f32
    %180 = vector.broadcast %cst_99 : f32 to vector<32x32xf32>
    %181 = vector.extract_strided_slice %179 {offsets = [0, 0], sizes = [1, 32], strides = [1, 1]} : vector<2x32xf32> to vector<1x32xf32>
    %182 = vector.broadcast %4 : vector<32x1xf32> to vector<32x32xf32>
    %183 = vector.broadcast %181 : vector<1x32xf32> to vector<32x32xf32>
    %184 = arith.mulf %182, %183 : vector<32x32xf32>
    %185 = arith.addf %180, %184 : vector<32x32xf32>
    %186 = vector.extract_strided_slice %179 {offsets = [1, 0], sizes = [1, 32], strides = [1, 1]} : vector<2x32xf32> to vector<1x32xf32>
    %187 = vector.broadcast %8 : vector<32x1xf32> to vector<32x32xf32>
    %188 = vector.broadcast %186 : vector<1x32xf32> to vector<32x32xf32>
    %189 = arith.mulf %187, %188 : vector<32x32xf32>
    %190 = arith.addf %185, %189 : vector<32x32xf32>
    %191 = arith.addf %112, %190 : vector<32x32xf32>
    %c0_100 = arith.constant 0 : index
    %c32 = arith.constant 32 : index
    %192 = vector.load %arg22[%c0_100, %c32] : memref<32x96xf32, #tpu.memory_space<vmem>>, vector<32x32xf32>
    tpu.vector_store %arg22[%c0_100, %c32], %191 {strides = array<i32>} : memref<32x96xf32, #tpu.memory_space<vmem>>, vector<32x32xf32>,
    %c0_101 = arith.constant 0 : index
    %c0_102 = arith.constant 0 : index
    %193 = vector.load %arg23[%c0_101, %c0_102] : memref<32x32xf32, #tpu.memory_space<vmem>>, vector<32x32xf32>
    tpu.vector_store %arg23[%c0_101, %c0_102], %191 {strides = array<i32>} : memref<32x32xf32, #tpu.memory_space<vmem>>, vector<32x32xf32>,
    %c0_103 = arith.constant 0 : index
    %c0_104 = arith.constant 0 : index
    %194 = vector.load %arg1[%c0_103, %c0_104] : memref<64x8xf32, #tpu.memory_space<vmem>>, vector<64x8xf32>
    %c1 = arith.constant 1 : index
    %c0_105 = arith.constant 0 : index
    %c0_106 = arith.constant 0 : index
    %195 = vector.load %arg10[%c1, %c0_105, %c0_106] : memref<2x8x32xf32, #tpu.memory_space<vmem>>, vector<1x8x32xf32>
    %196 = vector.shape_cast %195 : vector<1x8x32xf32> to vector<8x32xf32>
    %cst_107 = arith.constant dense<0.000000e+00> : vector<64x32xf32>
    %197 = tpu.matmul %194, %196, %cst_107 {dimension_numbers = #tpu.dot_dimension_numbers<[1], [0], [0], [1], [0, 0, 1, 1], [], []>} : vector<64x8xf32>, vector<8x32xf32>, vector<64x32xf32> -> vector<64x32xf32>
    %c1_108 = arith.constant 1 : index
    %c0_109 = arith.constant 0 : index
    %c0_110 = arith.constant 0 : index
    %198 = vector.load %arg11[%c1_108, %c0_109, %c0_110] : memref<2x1x32xf32, #tpu.memory_space<vmem>>, vector<1x1x32xf32>
    %199 = vector.shape_cast %198 : vector<1x1x32xf32> to vector<1x32xf32>
    %200 = vector.broadcast %199 : vector<1x32xf32> to vector<64x32xf32>
    %201 = arith.addf %197, %200 : vector<64x32xf32>
    %cst_111 = arith.constant 0.000000e+00 : f32
    %202 = vector.broadcast %cst_111 : f32 to vector<64x32xf32>
    %203 = arith.maximumf %201, %202 : vector<64x32xf32>
    %c0_112 = arith.constant 0 : index
    %c0_113 = arith.constant 0 : index
    %204 = vector.load %arg24[%c0_112, %c0_113] : memref<64x32xf32, #tpu.memory_space<vmem>>, vector<64x32xf32>
    tpu.vector_store %arg24[%c0_112, %c0_113], %203 {strides = array<i32>} : memref<64x32xf32, #tpu.memory_space<vmem>>, vector<64x32xf32>,
    %cst_114 = arith.constant 0.000000e+00 : f32
    %205 = vector.broadcast %cst_114 : f32 to vector<32x32xf32>
    %c0_115 = arith.constant 0 : index
    %c0_116 = arith.constant 0 : index
    %206 = vector.load %arg25[%c0_115, %c0_116] : memref<32x32xf32, #tpu.memory_space<vmem>>, vector<32x32xf32>
    tpu.vector_store %arg25[%c0_115, %c0_116], %205 {strides = array<i32>} : memref<32x32xf32, #tpu.memory_space<vmem>>, vector<32x32xf32>,
    %c0_i32_117 = arith.constant 0 : i32
    %c64_i32_118 = arith.constant 64 : i32
    %207 = arith.addi %c0_i32_117, %c64_i32_118 : i32
    %c1_i32_119 = arith.constant 1 : i32
    scf.for %arg26 = %c0_i32_117 to %207 step %c1_i32_119  : i32 {
      %263 = arith.index_cast %arg26 : i32 to index
      %264 = memref.load %arg3[%263] : memref<64xi32, #tpu.memory_space<smem>>
      %265 = arith.index_cast %arg26 : i32 to index
      %266 = memref.load %arg4[%265] : memref<64xi32, #tpu.memory_space<smem>>
      %267 = arith.index_cast %264 : i32 to index
      %c0_154 = arith.constant 0 : index
      %268 = vector.load %arg23[%267, %c0_154] : memref<32x32xf32, #tpu.memory_space<vmem>>, vector<1x32xf32>
      %269 = arith.index_cast %arg26 : i32 to index
      %c0_155 = arith.constant 0 : index
      %270 = vector.load %arg24[%269, %c0_155] : memref<64x32xf32, #tpu.memory_space<vmem>>, vector<1x32xf32>
      %271 = arith.addf %268, %270 : vector<1x32xf32>
      %cst_156 = arith.constant 0.000000e+00 : f32
      %272 = vector.broadcast %cst_156 : f32 to vector<1x32xf32>
      %273 = arith.maximumf %271, %272 : vector<1x32xf32>
      %274 = arith.index_cast %266 : i32 to index
      %c0_157 = arith.constant 0 : index
      %275 = vector.load %arg25[%274, %c0_157] : memref<32x32xf32, #tpu.memory_space<vmem>>, vector<1x32xf32>
      %276 = arith.addf %275, %273 : vector<1x32xf32>
      %277 = arith.index_cast %266 : i32 to index
      %c0_158 = arith.constant 0 : index
      %278 = vector.load %arg25[%277, %c0_158] : memref<32x32xf32, #tpu.memory_space<vmem>>, vector<1x32xf32>
      tpu.vector_store %arg25[%277, %c0_158], %276 {strides = array<i32>} : memref<32x32xf32, #tpu.memory_space<vmem>>, vector<1x32xf32>,
    }
    %c64_i32_120 = arith.constant 64 : i32
    %c1_121 = arith.constant 1 : index
    %208 = memref.load %arg5[%c1_121] : memref<2xf32, #tpu.memory_space<smem>>
    %cst_122 = arith.constant 1.000000e+00 : f32
    %209 = arith.addf %cst_122, %208 : f32
    %210 = vector.broadcast %209 : f32 to vector<32x32xf32>
    %211 = arith.mulf %210, %191 : vector<32x32xf32>
    %c0_123 = arith.constant 0 : index
    %c0_124 = arith.constant 0 : index
    %212 = vector.load %arg25[%c0_123, %c0_124] : memref<32x32xf32, #tpu.memory_space<vmem>>, vector<32x32xf32>
    %213 = arith.addf %211, %212 : vector<32x32xf32>
    %c1_125 = arith.constant 1 : index
    %c0_126 = arith.constant 0 : index
    %c0_127 = arith.constant 0 : index
    %214 = vector.load %arg12[%c1_125, %c0_126, %c0_127] : memref<2x32x64xf32, #tpu.memory_space<vmem>>, vector<1x32x64xf32>
    %215 = vector.shape_cast %214 : vector<1x32x64xf32> to vector<32x64xf32>
    %cst_128 = arith.constant dense<0.000000e+00> : vector<32x64xf32>
    %216 = tpu.matmul %213, %215, %cst_128 {dimension_numbers = #tpu.dot_dimension_numbers<[1], [0], [0], [1], [0, 0, 1, 1], [], []>} : vector<32x32xf32>, vector<32x64xf32>, vector<32x64xf32> -> vector<32x64xf32>
    %c1_129 = arith.constant 1 : index
    %c0_130 = arith.constant 0 : index
    %c0_131 = arith.constant 0 : index
    %217 = vector.load %arg13[%c1_129, %c0_130, %c0_131] : memref<2x1x64xf32, #tpu.memory_space<vmem>>, vector<1x1x64xf32>
    %218 = vector.shape_cast %217 : vector<1x1x64xf32> to vector<1x64xf32>
    %219 = vector.broadcast %218 : vector<1x64xf32> to vector<32x64xf32>
    %220 = arith.addf %216, %219 : vector<32x64xf32>
    %cst_132 = arith.constant 0.000000e+00 : f32
    %221 = vector.broadcast %cst_132 : f32 to vector<32x64xf32>
    %222 = arith.maximumf %220, %221 : vector<32x64xf32>
    %c1_133 = arith.constant 1 : index
    %c0_134 = arith.constant 0 : index
    %c0_135 = arith.constant 0 : index
    %223 = vector.load %arg14[%c1_133, %c0_134, %c0_135] : memref<2x64x32xf32, #tpu.memory_space<vmem>>, vector<1x64x32xf32>
    %224 = vector.shape_cast %223 : vector<1x64x32xf32> to vector<64x32xf32>
    %cst_136 = arith.constant dense<0.000000e+00> : vector<32x32xf32>
    %225 = tpu.matmul %222, %224, %cst_136 {dimension_numbers = #tpu.dot_dimension_numbers<[1], [0], [0], [1], [0, 0, 1, 1], [], []>} : vector<32x64xf32>, vector<64x32xf32>, vector<32x32xf32> -> vector<32x32xf32>
    %c1_137 = arith.constant 1 : index
    %c0_138 = arith.constant 0 : index
    %c0_139 = arith.constant 0 : index
    %226 = vector.load %arg15[%c1_137, %c0_138, %c0_139] : memref<2x1x32xf32, #tpu.memory_space<vmem>>, vector<1x1x32xf32>
    %227 = vector.shape_cast %226 : vector<1x1x32xf32> to vector<1x32xf32>
    %228 = vector.broadcast %227 : vector<1x32xf32> to vector<32x32xf32>
    %229 = arith.addf %225, %228 : vector<32x32xf32>
    %c1_140 = arith.constant 1 : index
    %c0_141 = arith.constant 0 : index
    %c0_142 = arith.constant 0 : index
    %230 = vector.load %arg16[%c1_140, %c0_141, %c0_142] : memref<2x1x32xf32, #tpu.memory_space<vmem>>, vector<1x1x32xf32>
    %231 = vector.shape_cast %230 : vector<1x1x32xf32> to vector<1x32xf32>
    %c1_143 = arith.constant 1 : index
    %c0_144 = arith.constant 0 : index
    %c0_145 = arith.constant 0 : index
    %232 = vector.load %arg17[%c1_143, %c0_144, %c0_145] : memref<2x1x32xf32, #tpu.memory_space<vmem>>, vector<1x1x32xf32>
    %233 = vector.shape_cast %232 : vector<1x1x32xf32> to vector<1x32xf32>
    %cst_146 = arith.constant dense<0.000000e+00> : vector<32xf32>
    %234 = vector.multi_reduction <add>, %229, %cst_146 [1] : vector<32x32xf32> to vector<32xf32>
    %235 = vector.shape_cast %234 : vector<32xf32> to vector<32x1xf32>
    %cst_147 = arith.constant 3.200000e+01 : f32
    %236 = vector.broadcast %cst_147 : f32 to vector<32x1xf32>
    %237 = arith.divf %235, %236 : vector<32x1xf32>
    %238 = vector.broadcast %237 : vector<32x1xf32> to vector<32x32xf32>
    %239 = arith.subf %229, %238 : vector<32x32xf32>
    %240 = arith.mulf %239, %239 : vector<32x32xf32>
    %cst_148 = arith.constant dense<0.000000e+00> : vector<32xf32>
    %241 = vector.multi_reduction <add>, %240, %cst_148 [1] : vector<32x32xf32> to vector<32xf32>
    %242 = vector.shape_cast %241 : vector<32xf32> to vector<32x1xf32>
    %cst_149 = arith.constant 3.200000e+01 : f32
    %243 = vector.broadcast %cst_149 : f32 to vector<32x1xf32>
    %244 = arith.divf %242, %243 : vector<32x1xf32>
    %245 = vector.broadcast %237 : vector<32x1xf32> to vector<32x32xf32>
    %246 = arith.subf %229, %245 : vector<32x32xf32>
    %cst_150 = arith.constant 9.99999974E-6 : f32
    %247 = vector.broadcast %cst_150 : f32 to vector<32x1xf32>
    %248 = arith.addf %244, %247 : vector<32x1xf32>
    %249 = math.rsqrt %248 : vector<32x1xf32>
    %250 = vector.broadcast %249 : vector<32x1xf32> to vector<32x32xf32>
    %251 = arith.mulf %246, %250 : vector<32x32xf32>
    %252 = vector.broadcast %231 : vector<1x32xf32> to vector<32x32xf32>
    %253 = arith.mulf %251, %252 : vector<32x32xf32>
    %254 = vector.broadcast %233 : vector<1x32xf32> to vector<32x32xf32>
    %255 = arith.addf %253, %254 : vector<32x32xf32>
    %cst_151 = arith.constant 0.000000e+00 : f32
    %256 = vector.broadcast %cst_151 : f32 to vector<32x32xf32>
    %257 = arith.cmpf ogt, %255, %256 : vector<32x32xf32>
    %cst_152 = arith.constant 1.000000e-01 : f32
    %258 = vector.broadcast %cst_152 : f32 to vector<32x32xf32>
    %259 = arith.mulf %258, %255 : vector<32x32xf32>
    %260 = arith.select %257, %255, %259 : vector<32x32xi1>, vector<32x32xf32>
    %261 = arith.addf %260, %191 : vector<32x32xf32>
    %c0_153 = arith.constant 0 : index
    %c64 = arith.constant 64 : index
    %262 = vector.load %arg22[%c0_153, %c64] : memref<32x96xf32, #tpu.memory_space<vmem>>, vector<32x32xf32>
    tpu.vector_store %arg22[%c0_153, %c64], %261 {strides = array<i32>} : memref<32x96xf32, #tpu.memory_space<vmem>>, vector<32x32xf32>,
    return
  }
}

</mosaic_0001>

<bundles_post_ra>
// kernel: gnn_node_virtualnode_forward.1
= control target key start
LH: loop header
LB: loop body
LE: loop exit
PB: predicated region body
PF: predicated region fallthrough
CT: control target
= control target key end

     0   :  { %s2364_s0 = inlined_call_operand.vmem [shape: f32[32,16], index: 0, kind: input, shape index: {}]   ;;  %s2365_s1 = inlined_call_operand.vmem [shape: f32[64,8], index: 1, kind: input, shape index: {}]   ;;  %s2366_s2 = inlined_call_operand.vmem [shape: s32[32,1], index: 2, kind: input, shape index: {}]   ;;  %s2367_s3 = inlined_call_operand.vmem [shape: s32[64], index: 3, kind: input, shape index: {}]   ;;  %s2368_s4 = inlined_call_operand.vmem [shape: s32[64], index: 4, kind: input, shape index: {}]   ;;  %s2369_s5 = inlined_call_operand.vmem [shape: f32[2], index: 5, kind: input, shape index: {}]   ;;  %s2370_s6 = inlined_call_operand.vmem [shape: f32[16,64], index: 6, kind: input, shape index: {}]   ;;  %s2371_s7 = inlined_call_operand.vmem [shape: f32[1,64], index: 7, kind: input, shape index: {}]   ;;  %s2372_s8 = inlined_call_operand.vmem [shape: f32[64,32], index: 8, kind: input, shape index: {}]   ;;  %s2373_s9 = inlined_call_operand.vmem [shape: f32[1,32], index: 9, kind: input, shape index: {}]   ;;  %s2374_s10 = inlined_call_operand.vmem [shape: f32[2,8,32], index: 10, kind: input, shape index: {}]   ;;  %s2375_s11 = inlined_call_operand.vmem [shape: f32[2,1,32], index: 11, kind: input, shape index: {}]   ;;  %s2376_s12 = inlined_call_operand.vmem [shape: f32[2,32,64], index: 12, kind: input, shape index: {}]   ;;  %s2377_s13 = inlined_call_operand.vmem [shape: f32[2,1,64], index: 13, kind: input, shape index: {}]   ;;  %s2378_s14 = inlined_call_operand.vmem [shape: f32[2,64,32], index: 14, kind: input, shape index: {}]   ;;  %s2379_s15 = inlined_call_operand.vmem [shape: f32[2,1,32], index: 15, kind: input, shape index: {}]   ;;  %s2380_s16 = inlined_call_operand.vmem [shape: f32[2,1,32], index: 16, kind: input, shape index: {}]   ;;  %s2381_s17 = inlined_call_operand.vmem [shape: f32[2,1,32], index: 17, kind: input, shape index: {}]   ;;  %s2382_s18 = inlined_call_operand.vmem [shape: f32[1,32,64], index: 18, kind: input, shape index: {}]   ;;  %s2383_s19 = inlined_call_operand.vmem [shape: f32[1,1,64], index: 19, kind: input, shape index: {}]   ;;  %s2384_s20 = inlined_call_operand.vmem [shape: f32[1,64,32], index: 20, kind: input, shape index: {}]   ;;  %s2385_s21 = inlined_call_operand.vmem [shape: f32[1,1,32], index: 21, kind: input, shape index: {}]   ;;  %s2386_s22 = inlined_call_operand.hbm [shape: f32[32,96], index: 22, kind: output, shape index: {}]  }
   0x1   :  { %2392 = sst [smem:[#allocation15_spill]] %s2364_s0 }
   0x2   :  { %2393 = sst [smem:[#allocation16_spill]] %s2365_s1 }
   0x3   :  { %2394 = sst [smem:[#allocation17_spill]] %s2366_s2 }
   0x4   :  { %2395 = sst [smem:[#allocation18_spill]] %s2367_s3 }
   0x5   :  { %2396 = sst [smem:[#allocation19_spill]] %s2368_s4 }
   0x6   :  { %2397 = sst [smem:[#allocation20_spill]] %s2369_s5 }
   0x7   :  { %2398 = sst [smem:[#allocation21_spill]] %s2370_s6 }
   0x8   :  { %27 = vsyncpa [#allocation7], 0 }
   0x9   :  { %28 = vsyncpa [#allocation9], 0  ;;  %s2399_s29 = sld [smem:[#allocation19_spill]] }
   0xf   :  { %s50_s30 = sshll.u32 %s2399_s29, 4  ;;  %s51_s30 = int_to_ptr.vmem [resolvable:$true] %s50_s30 }
  0x10   :  { %29 = vsyncpa [#allocation6], 0  ;;  %s2400_s23 = sld [smem:[#allocation18_spill]]  ;;  %s1605_s5 = smov [#allocation8]  }
  0x11   :  { %53 = dma.vmem_to_smem %s51_s30, 16, %s1605_s5, [#allocation9]  }
  0x12   :  { %s1606_s24 = smov [#allocation5]   ;;  %s2401_s26 = sld [smem:[#allocation20_spill]] }
  0x13   :  { %s1607_s27 = smov [#allocation10]  }
  0x16   :  { %s41_s1 = sshll.u32 %s2400_s23, 4  ;;  %s42_s1 = int_to_ptr.vmem [resolvable:$true] %s41_s1 }
  0x17   :  { %44 = dma.vmem_to_smem %s42_s1, 16, %s1606_s24, [#allocation7]  }
  0x18   :  { %s59_s2 = sshll.u32 %s2401_s26, 4  ;;  %s60_s2 = int_to_ptr.vmem [resolvable:$true] %s59_s2 }
  0x19   :  { %62 = dma.vmem_to_smem %s60_s2, 16, %s1607_s27, [#allocation9]  }
  0x1a   :  { %1591 = dma.done.wait [#allocation7], 16  }
  0x1b   :  { %1592 = vsyncadd [#allocation7], 4294967280 }
  0x1c   :  { %1593 = dma.done.wait [#allocation9], 32  }
  0x1d   :  { %1594 = vsyncadd [#allocation9], 4294967264 }
  0x1e   :  { %107 = sfence }
  0x1f   :  { %s2402_s29 = sld [smem:[#allocation21_spill]]  ;;  %vm146_vm0 = vcmask 130048   ;;  %vm348_vm1 = vcmask 64512   ;;  %v343_v3 = vld [vmem:[%s2374_s10] sm:$0xff]  ;;  %v207_v5 = vld [vmem:[%s2372_s8 + $0x38] sm:$0xff]  ;;  %v206_v6 = vld [vmem:[%s2372_s8 + $0x30] sm:$0xff] }
  0x20   :  { %s2403_s1 = sld [smem:[#allocation15_spill]]  ;;  %388 = vmatpush.msra.mxu2 %v343_v3  ;;  %233 = vmatpush.msra.mxu1 %v207_v5  ;;  %v205_v7 = vld [vmem:[%s2372_s8 + $0x28] sm:$0xff]  ;;  %v204_v8 = vld [vmem:[%s2372_s8 + $0x20] sm:$0xff]  ;;  %v203_v11 = vld [vmem:[%s2372_s8 + $0x18] sm:$0xff]  ;;  %v1608_v23 = vmov 0.0   ;;  %v1609_v29 = vmov 0  }
  0x21   :  { %s2404_s26 = sld [smem:[#allocation16_spill]]  ;;  %v202_v16 = vld [vmem:[%s2372_s8 + $0x10] sm:$0xff]  ;;  %v201_v17 = vld [vmem:[%s2372_s8 + $0x8] sm:$0xff]  ;;  %v200_v19 = vld [vmem:[%s2372_s8] sm:$0xff]  ;;  %1476 = vset.pattern.permute.xlu1 %v1609_v29  ;;  %1465 = vset.pattern.permute.xlu0 %v1609_v29  ;;  %vm326_vm6 = vcmask 261120   ;;  %vm212_vm12 = vcmask 523264  }
  0x22   :  { %234 = vmatpush.msra.mxu1 %v206_v6  ;;  %s2405_s0 = sld [smem:[#allocation17_spill]]  ;;  %430 = vst.msk [vmem:[#allocation4] sm:$0xff] %vm326_vm6, %v1608_v23  ;;  %v1487_v35 = vld [vmem:[%s2371_s7] ss:$0 sm:$0xff] }
  0x23   :  { %431 = vst.msk [vmem:[#allocation4 + $0x8] sm:$0xff] %vm326_vm6, %v1608_v23  ;;  %v1488_v45 = vld [vmem:[%s2375_s11] ss:$0 sm:$0xff] }
  0x24   :  { %235 = vmatpush.msra.mxu1 %v205_v7  ;;  %432 = vst.msk [vmem:[#allocation4 + $0x10] sm:$0xff] %vm326_vm6, %v1608_v23 }
  0x25   :  { %v141_v0 = vld [vmem:[%s2402_s29 + $0x8] sm:$0xff]  ;;  %v140_v1 = vld [vmem:[%s2402_s29] sm:$0xff]  ;;  %433 = vst.msk [vmem:[#allocation4 + $0x18] sm:$0xff] %vm326_vm6, %v1608_v23 }
  0x26   :  { %173 = vmatpush.msra.mxu0 %v141_v0  ;;  %v136_v2 = vld [vmem:[%s2403_s1] sm:$0xff]  ;;  %v137_v9 = vld [vmem:[%s2403_s1 + $0x8] sm:$0xff]  ;;  %236 = vmatpush.msra.mxu1 %v204_v8  ;;  %v138_v12 = vld [vmem:[%s2403_s1 + $0x10] sm:$0xff] }
  0x27   :  { %v335_v4 = vld [vmem:[%s2404_s26] sm:$0xff]  ;;  %v336_v10 = vld [vmem:[%s2404_s26 + $0x8] sm:$0xff]  ;;  %v337_v13 = vld [vmem:[%s2404_s26 + $0x10] sm:$0xff] }
  0x28   :  { %174 = vmatpush.msra.mxu0 %v140_v1  ;;  %1374 = vmatmul.msk.f32.vlgmr.msra.gmra.mxu2 %vm348_vm1, %v335_v4  ;;  %v139_v14 = vld [vmem:[%s2403_s1 + $0x18] sm:$0xff]  ;;  %v339_v18 = vld [vmem:[%s2404_s26 + $0x20] sm:$0xff]  ;;  %v340_v20 = vld [vmem:[%s2404_s26 + $0x28] sm:$0xff] }
  0x29   :  { %1366 = vmatmul.msk.f32.vlgmr.msra.gmra.mxu0 %vm146_vm0, %v136_v2  ;;  %237 = vmatpush.msra.mxu1 %v203_v11  ;;  %v338_v15 = vld [vmem:[%s2404_s26 + $0x18] sm:$0xff]  ;;  %v108_v21 = vld [vmem:[%s2405_s0] sm:$0xff]  ;;  %v109_v22 = vld [vmem:[%s2405_s0 + $0x8] sm:$0xff] }
  0x2a   :  { %vm124_vm2 = vcmp.eq.s32.totalorder %v108_v21, 1  ;;  %vm125_vm3 = vcmp.eq.s32.totalorder %v109_v22, 1  ;;  %vm112_vm4 = vcmp.eq.s32.totalorder %v108_v21, 0  ;;  %vm113_vm5 = vcmp.eq.s32.totalorder %v109_v22, 0  ;;  %v341_v31 = vld [vmem:[%s2404_s26 + $0x30] sm:$0xff]  ;;  %v342_v32 = vld [vmem:[%s2404_s26 + $0x38] sm:$0xff] }
  0x2b   :  { %238 = vmatpush.msra.mxu1 %v202_v16  ;;  %v1821_v24 = vsel %vm124_vm2, 1.0, %v1608_v23  ;;  %v1824_v25 = vsel %vm125_vm3, 1.0, %v1608_v23  ;;  %v1827_v26 = vsel %vm112_vm4, 1.0, %v1608_v23  ;;  %v1832_v28 = vsel %vm113_vm5, 1.0, %v1608_v23  ;;  %v110_v33 = vld [vmem:[%s2405_s0 + $0x10] sm:$0xff]  ;;  %v111_v34 = vld [vmem:[%s2405_s0 + $0x18] sm:$0xff] }
  0x2c   :  { %v1477_v27 = vpack.i.bf16 %v1824_v25, %v1821_v24  ;;  %v1466_v30 = vpack.i.bf16 %v1832_v28, %v1827_v26  ;;  %vm126_vm7 = vcmp.eq.s32.totalorder %v110_v33, 1  ;;  %vm127_vm8 = vcmp.eq.s32.totalorder %v111_v34, 1  ;;  %v1489_v21 = vld [vmem:[%s2373_s9] ss:$0 sm:$0xff]  ;;  %s1597_s9 = smov 0  }
  0x2d   :  { %239 = vmatpush.msra.mxu1 %v201_v17  ;;  %vm114_vm9 = vcmp.eq.s32.totalorder %v110_v33, 0  ;;  %vm115_vm10 = vcmp.eq.s32.totalorder %v111_v34, 0  ;;  %v1862_v36 = vsel %vm126_vm7, 1.0, %v1608_v23  ;;  %v1865_v37 = vsel %vm127_vm8, 1.0, %v1608_v23 }
  0x2e   :  { %1478 = vperm.xlu1 %1476, %v1477_v27   ;;  %1467 = vperm.xlu0 %1465, %v1466_v30   ;;  %v1868_v38 = vsel %vm114_vm9, 1.0, %v1608_v23  ;;  %v1871_v39 = vsel %vm115_vm10, 1.0, %v1608_v23  ;;  %v1482_v40 = vpack.i.bf16 %v1865_v37, %v1862_v36 }
  0x2f   :  { %240 = vmatpush.msra.mxu1 %v200_v19  ;;  %v1471_v41 = vpack.i.bf16 %v1871_v39, %v1868_v38 }
  0x30   :  { %1375 = vmatmul.msk.f32.gmra.mxu2 %vm348_vm1, %v336_v10 }
  0x31   :  { %1367 = vmatmul.msk.f32.gmra.mxu0 %vm146_vm0, %v137_v9 }
  0x36   :  { %1483 = vperm.xlu1 %1476, %v1482_v40   ;;  %1472 = vperm.xlu0 %1465, %v1471_v41  }
  0x38   :  { %1376 = vmatmul.msk.f32.gmra.mxu2 %vm348_vm1, %v337_v13 }
  0x39   :  { %1368 = vmatmul.msk.f32.gmra.mxu0 %vm146_vm0, %v138_v12 }
  0x40   :  { %1377 = vmatmul.msk.f32.gmra.mxu2 %vm348_vm1, %v338_v15 }
  0x41   :  { %1369 = vmatmul.msk.f32.gmra.mxu0 %vm146_vm0, %v139_v14 }
  0x48   :  { %1378 = vmatmul.msk.f32.gmra.mxu2 %vm348_vm1, %v339_v18 }
  0x50   :  { %1379 = vmatmul.msk.f32.gmra.mxu2 %vm348_vm1, %v340_v20 }
  0x58   :  { %1380 = vmatmul.msk.f32.gmra.mxu2 %vm348_vm1, %v341_v31 }
  0x60   :  { %1381 = vmatmul.msk.f32.gmra.mxu2 %vm348_vm1, %v342_v32 }
  0xa0   :  { %v1479_v15 = vpop.permute.xlu1 %1478  ;;  %v1468_v16 = vpop.permute.xlu0 %1467 }
  0xa1   :  { %v1891_v18 = vunpack.i.l.bf16 %v1479_v15  ;;  %v1893_v19 = vunpack.i.l.bf16 %v1468_v16  ;;  %v1901_v33 = vunpack.i.h.bf16 %v1479_v15  ;;  %v1903_v34 = vunpack.i.h.bf16 %v1468_v16 }
  0xa3   :  { %v314_v27 = vmul.f32 0.0, %v1891_v18  ;;  %v286_v29 = vmul.f32 0.0, %v1893_v19 }
  0xa6   :  { %v176_v42 = vpop.f32.mrf.mxu0 }
  0xa7   :  { %v177_v43 = vadd.f32 %v1487_v35, %v176_v42  ;;  %v315_v42 = vmul.f32 0.0, %v1901_v33 }
  0xa9   :  { %v192_v44 = vmul.f32 0.1, %v177_v43  ;;  %vm188_vm11 = vcmp.gt.f32.partialorder %v177_v43, 0.0 }
  0xab   :  { %v196_v46 = vsel %vm188_vm11, %v177_v43, %v192_v44  ;;  %v390_v47 = vpop.f32.mrf.mxu2  ;;  %v287_v43 = vmul.f32 0.0, %v1903_v34 }
  0xac   :  { %1370 = vmatmul.msk.f32.vlgmr.msra.gmra.mxu1 %vm212_vm12, %v196_v46  ;;  %v391_v48 = vadd.f32 %v1488_v45, %v390_v47  ;;  %v1473_v46 = vpop.permute.xlu0 %1472 }
  0xae   :  { %v179_v49 = vpop.f32.mrf.mxu0  ;;  %v414_v51 = vmax.f32 %v391_v48, 0.0 }
  0xaf   :  { %v180_v50 = vadd.f32 %v1487_v35, %v179_v49  ;;  %v319_v49 = vadd.f32 %v315_v42, %v287_v43 }
  0xb0   :  { %422 = vst.msk [vmem:[#allocation3] sm:$0xff] %vm326_vm6, %v414_v51  ;;  %v1915_v51 = vunpack.i.l.bf16 %v1473_v46 }
  0xb1   :  { %v193_v52 = vmul.f32 0.1, %v180_v50  ;;  %vm189_vm13 = vcmp.gt.f32.partialorder %v180_v50, 0.0 }
  0xb3   :  { %v197_v53 = vsel %vm189_vm13, %v180_v50, %v193_v52  ;;  %v393_v54 = vpop.f32.mrf.mxu2 }
  0xb4   :  { %1371 = vmatmul.msk.f32.gmra.mxu1 %vm212_vm12, %v197_v53  ;;  %v394_v55 = vadd.f32 %v1488_v45, %v393_v54 }
  0xb6   :  { %v182_v56 = vpop.f32.mrf.mxu0  ;;  %v415_v58 = vmax.f32 %v394_v55, 0.0 }
  0xb7   :  { %v183_v57 = vadd.f32 %v1487_v35, %v182_v56  ;;  %v288_v56 = vmul.f32 0.0, %v1915_v51 }
  0xb8   :  { %423 = vst.msk [vmem:[#allocation3 + $0x8] sm:$0xff] %vm326_vm6, %v415_v58 }
  0xb9   :  { %v194_v59 = vmul.f32 0.1, %v183_v57  ;;  %vm190_vm14 = vcmp.gt.f32.partialorder %v183_v57, 0.0 }
  0xbb   :  { %v198_v60 = vsel %vm190_vm14, %v183_v57, %v194_v59  ;;  %v396_v61 = vpop.f32.mrf.mxu2 }
  0xbc   :  { %1372 = vmatmul.msk.f32.gmra.mxu1 %vm212_vm12, %v198_v60  ;;  %v397_v62 = vadd.f32 %v1488_v45, %v396_v61 }
  0xbe   :  { %v185_v63 = vpop.f32.mrf.mxu0  ;;  %v416_v1 = vmax.f32 %v397_v62, 0.0  ;;  %v1927_v62 = vunpack.i.h.bf16 %v1473_v46 }
  0xbf   :  { %v186_v0 = vadd.f32 %v1487_v35, %v185_v63  ;;  %v318_v35 = vadd.f32 %v314_v27, %v286_v29 }
  0xc0   :  { %424 = vst.msk [vmem:[#allocation3 + $0x10] sm:$0xff] %vm326_vm6, %v416_v1 }
  0xc1   :  { %v195_v2 = vmul.f32 0.1, %v186_v0  ;;  %vm191_vm15 = vcmp.gt.f32.partialorder %v186_v0, 0.0 }
  0xc3   :  { %v199_v3 = vsel %vm191_vm15, %v186_v0, %v195_v2  ;;  %v399_v4 = vpop.f32.mrf.mxu2  ;;  %v289_v2 = vmul.f32 0.0, %v1927_v62 }
  0xc4   :  { %1373 = vmatmul.msk.f32.gmra.mxu1 %vm212_vm12, %v199_v3  ;;  %v400_v5 = vadd.f32 %v1488_v45, %v399_v4 }
  0xc6   :  { %v417_v6 = vmax.f32 %v400_v5, 0.0 }
  0xc8   :  { %425 = vst.msk [vmem:[#allocation3 + $0x18] sm:$0xff] %vm326_vm6, %v417_v6 }
  0xcb   :  { %v402_v7 = vpop.f32.mrf.mxu2 }
  0xcc   :  { %v403_v8 = vadd.f32 %v1488_v45, %v402_v7 }
  0xce   :  { %v418_v9 = vmax.f32 %v403_v8, 0.0 }
  0xd0   :  { %426 = vst.msk [vmem:[#allocation3 + $0x20] sm:$0xff] %vm326_vm6, %v418_v9 }
  0xd3   :  { %v405_v10 = vpop.f32.mrf.mxu2 }
  0xd4   :  { %v406_v11 = vadd.f32 %v1488_v45, %v405_v10 }
  0xd6   :  { %v419_v12 = vmax.f32 %v406_v11, 0.0 }
  0xd8   :  { %427 = vst.msk [vmem:[#allocation3 + $0x28] sm:$0xff] %vm326_vm6, %v419_v12 }
  0xdb   :  { %v408_v13 = vpop.f32.mrf.mxu2 }
  0xdc   :  { %v409_v14 = vadd.f32 %v1488_v45, %v408_v13 }
  0xde   :  { %v420_v17 = vmax.f32 %v409_v14, 0.0 }
  0xe0   :  { %428 = vst.msk [vmem:[#allocation3 + $0x30] sm:$0xff] %vm326_vm6, %v420_v17 }
  0xe3   :  { %v411_v20 = vpop.f32.mrf.mxu2 }
  0xe4   :  { %v412_v22 = vadd.f32 %v1488_v45, %v411_v20  ;;  %v1484_v45 = vpop.permute.xlu1 %1483 }
  0xe5   :  { %v1913_v50 = vunpack.i.l.bf16 %v1484_v45  ;;  %v1925_v61 = vunpack.i.h.bf16 %v1484_v45 }
  0xe6   :  { %v421_v30 = vmax.f32 %v412_v22, 0.0 }
  0xe7   :  { %v316_v55 = vmul.f32 0.0, %v1913_v50  ;;  %v317_v1 = vmul.f32 0.0, %v1925_v61 }
  0xe8   :  { %429 = vst.msk [vmem:[#allocation3 + $0x38] sm:$0xff] %vm326_vm6, %v421_v30 }
  0xe9   :  { %v320_v59 = vadd.f32 %v316_v55, %v288_v56  ;;  %v321_v6 = vadd.f32 %v317_v1, %v289_v2 }
 0x129   :  { %v242_v31 = vpop.f32.mrf.mxu1 }
 0x12a   :  { %v243_v32 = vadd.f32 %v1489_v21, %v242_v31 }
 0x12c   :  { %vm254_vm0 = vcmp.gt.f32.partialorder %v243_v32, 0.0  ;;  %v258_v40 = vmul.f32 0.1, %v243_v32 }
 0x12e   :  { %v262_v41 = vsel %vm254_vm0, %v243_v32, %v258_v40 }
 0x12f   :  { %v1907_v44 = vadd.f32 %v318_v35, %v262_v41 }
 0x131   :  { %327 = vst.msk [vmem:[#allocation11] sm:$0xff] %vm326_vm6, %v1907_v44  ;;  %v245_v47 = vpop.f32.mrf.mxu1 }
 0x132   :  { %331 = vst.msk [vmem:[#allocation2] sm:$0xff] %vm326_vm6, %v1907_v44  ;;  %v246_v48 = vadd.f32 %v1489_v21, %v245_v47 }
 0x134   :  { %vm255_vm2 = vcmp.gt.f32.partialorder %v246_v48, 0.0  ;;  %v259_v52 = vmul.f32 0.1, %v246_v48 }
 0x136   :  { %v263_v53 = vsel %vm255_vm2, %v246_v48, %v259_v52 }
 0x137   :  { %v1917_v54 = vadd.f32 %v319_v49, %v263_v53 }
 0x139   :  { %328 = vst.msk [vmem:[#allocation11 + $0x8] sm:$0xff] %vm326_vm6, %v1917_v54  ;;  %v248_v57 = vpop.f32.mrf.mxu1 }
 0x13a   :  { %332 = vst.msk [vmem:[#allocation2 + $0x8] sm:$0xff] %vm326_vm6, %v1917_v54  ;;  %v249_v58 = vadd.f32 %v1489_v21, %v248_v57 }
 0x13c   :  { %vm256_vm3 = vcmp.gt.f32.partialorder %v249_v58, 0.0  ;;  %v260_v60 = vmul.f32 0.1, %v249_v58 }
 0x13e   :  { %v264_v63 = vsel %vm256_vm3, %v249_v58, %v260_v60 }
 0x13f   :  { %v1929_v0 = vadd.f32 %v320_v59, %v264_v63 }
 0x141   :  { %329 = vst.msk [vmem:[#allocation11 + $0x10] sm:$0xff] %vm326_vm6, %v1929_v0  ;;  %v251_v3 = vpop.f32.mrf.mxu1 }
 0x142   :  { %333 = vst.msk [vmem:[#allocation2 + $0x10] sm:$0xff] %vm326_vm6, %v1929_v0  ;;  %v252_v4 = vadd.f32 %v1489_v21, %v251_v3 }
 0x144   :  { %vm257_vm4 = vcmp.gt.f32.partialorder %v252_v4, 0.0  ;;  %v261_v5 = vmul.f32 0.1, %v252_v4 }
 0x146   :  { %v265_v7 = vsel %vm257_vm4, %v252_v4, %v261_v5 }
 0x147   :  { %v1937_v8 = vadd.f32 %v321_v6, %v265_v7 }
 0x149   :  { %330 = vst.msk [vmem:[#allocation11 + $0x18] sm:$0xff] %vm326_vm6, %v1937_v8 }
 0x14a   :  { %334 = vst.msk [vmem:[#allocation2 + $0x18] sm:$0xff] %vm326_vm6, %v1937_v8 }
 0x14b LB: > { %s440_s0 = sld [smem:[#allocation5 + %s1599_s9]]  ;;  %s444_s5 = scalar_lea.vmem [#allocation3], %s1599_s9  ;;  %vm451_vm5 = vcmask 253952   ;;  %s1599_s9 = sphi %s1597_s9, %s439_s9  }
 0x14c   : > { %s441_s23 = sld [smem:[#allocation8 + %s1599_s9]]  ;;  %v445_v9 = vld [vmem:[%s444_s5] sm:$0x1]  ;;  %s439_s9 = sadd.s32 1, %s1599_s9  }
 0x14d   : > { %p436_p0 = scmp.ge.s32.totalorder %s439_s9, 64  }
 0x14e   :  { %v471_v15 = vld [vmem:[%s2376_s12 + $0x18] sm:$0xff] (%p436_p0)  ;;  %v470_v16 = vld [vmem:[%s2376_s12 + $0x10] sm:$0xff] (%p436_p0)  ;;  %s1950_s1 = sld [smem:[#allocation10]] (%p436_p0)  ;;  %vm701_vm7 = vcmask (%p436_p0), 7168   ;;  %v469_v27 = vld [vmem:[%s2376_s12 + $0x8] sm:$0xff] (%p436_p0)  ;;  %s1610_s25 = smov (%p436_p0), 1.0  }
 0x14f   :  { %500 = vmatpush.msrb.mxu0 (%p436_p0), %v471_v15  ;;  %1429 = vmatpush.msra.mxu3 (%p436_p0), %v471_v15  ;;  %v702_v20 = vsel (%p436_p0), %vm701_vm7, %v1827_v26, 0.0  ;;  %v703_v21 = vsel (%p436_p0), %vm701_vm7, %v1832_v28, 0.0  ;;  %v705_v22 = vsel (%p436_p0), %vm701_vm7, %v1868_v38, 0.0  ;;  %v759_v31 = vsel (%p436_p0), %vm701_vm7, %v1821_v24, 0.0  ;;  %v468_v32 = vld [vmem:[%s2376_s12] sm:$0xff] (%p436_p0)  ;;  %v527_v42 = vld [vmem:[%s2378_s14 + $0x30] sm:$0xff] (%p436_p0) }
 0x150   :  { %v704_v30 = vadd.f32 (%p436_p0), %v703_v21, %v702_v20  ;;  %v760_v26 = vsel (%p436_p0), %vm701_vm7, %v1824_v25, 0.0  ;;  %v707_v38 = vsel (%p436_p0), %vm701_vm7, %v1871_v39, 0.0  ;;  %v762_v40 = vsel (%p436_p0), %vm701_vm7, %v1862_v36, 0.0  ;;  %v528_v39 = vld [vmem:[%s2378_s14 + $0x38] sm:$0xff] (%p436_p0)  ;;  %v526_v48 = vld [vmem:[%s2378_s14 + $0x28] sm:$0xff] (%p436_p0)  ;;  %v525_v53 = vld [vmem:[%s2378_s14 + $0x20] sm:$0xff] (%p436_p0) }
 0x151   : > { %s442_s8 = scalar_lea.vmem [#allocation2], %s440_s0  ;;  %501 = vmatpush.msrb.mxu0 (%p436_p0), %v470_v16  ;;  %1430 = vmatpush.msra.mxu3 (%p436_p0), %v470_v16  ;;  %v761_v25 = vadd.f32 (%p436_p0), %v760_v26, %v759_v31  ;;  %v764_v47 = vsel (%p436_p0), %vm701_vm7, %v1865_v37, 0.0  ;;  %v524_v37 = vld [vmem:[%s2378_s14 + $0x18] sm:$0xff] (%p436_p0)  ;;  %v523_v57 = vld [vmem:[%s2378_s14 + $0x10] sm:$0xff] (%p436_p0)  ;;  %v522_v59 = vld [vmem:[%s2378_s14 + $0x8] sm:$0xff] (%p436_p0)  ;;  %s2408_s29 = sld [smem:[#allocation16_spill]] (%p436_p0) }
 0x152   : > { %v443_v10 = vld [vmem:[%s442_s8] sm:$0x1]  ;;  %s448_s24 = scalar_lea.vmem [#allocation4], %s441_s23  ;;  %v706_v35 = vadd.f32 (%p436_p0), %v705_v22, %v704_v30 }
 0x153   : > { %v446_v11 = vadd.f32 %v445_v9, %v443_v10  ;;  %v449_v12 = vld [vmem:[%s448_s24] sm:$0x1]  ;;  %502 = vmatpush.msrb.mxu0 (%p436_p0), %v469_v27  ;;  %1431 = vmatpush.msra.mxu3 (%p436_p0), %v469_v27  ;;  %v763_v45 = vadd.f32 (%p436_p0), %v762_v40, %v761_v25  ;;  %v817_v25 = vld [vmem:[%s2382_s18 + $0x10] sm:$0xff] (%p436_p0)  ;;  %v719_v40 = vmul.f32 (%p436_p0), %v1893_v19, %v1907_v44 }
 0x154   :  { %s454_s4 = sadd.f32 (%p436_p0), 1.0, %s1950_s1  ;;  %v708_v41 = vadd.f32 (%p436_p0), %v707_v38, %v706_v35  ;;  %v521_v1 = vld [vmem:[%s2378_s14] sm:$0xff] (%p436_p0)  ;;  %v818_v35 = vld [vmem:[%s2382_s18 + $0x18] sm:$0xff] (%p436_p0) }
 0x155   : > { %v447_v13 = vmax.f32 %v446_v11, 0.0  ;;  %438 = sbr.rel (!%p436_p0) target bundleno = 331 (0x14b), region = 148  ;;  %503 = vmatpush.msrb.mxu0 (%p436_p0), %v468_v32  ;;  %1432 = vmatpush.msra.mxu3 (%p436_p0), %v468_v32  ;;  %v765_v55 = vadd.f32 (%p436_p0), %v764_v47, %v763_v45  ;;  %v1490_v9 = vld [vmem:[%s2377_s13] ss:$0 sm:$0xff] (%p436_p0)  ;;  %v777_v45 = vmul.f32 (%p436_p0), %v1901_v33, %v1917_v54  ;;  %v723_v47 = vsel (%p436_p0), %vm326_vm6, %v719_v40, 0.0 }
 0x156   :  { %v455_v43 = vstv (%p436_p0), %s454_s4  ;;  %709 = vadd.xlane.f32.xlu0 (%p436_p0), %v708_v41  ;;  %v721_v41 = vmul.f32 (%p436_p0), %v1915_v51, %v1929_v0 }
 0x157   : > { %v450_v14 = vadd.f32 %v449_v12, %v447_v13  ;;  %553 = vmatpush.msra.mxu0 (%p436_p0), %v528_v39  ;;  %v456_v46 = vmul.f32 (%p436_p0), %v455_v43, %v1907_v44  ;;  %v459_v36 = vmul.f32 (%p436_p0), %v455_v43, %v1937_v8  ;;  %v457_v56 = vmul.f32 (%p436_p0), %v455_v43, %v1917_v54 }
 0x158   :  { %v458_v60 = vmul.f32 (%p436_p0), %v455_v43, %v1929_v0  ;;  %v720_v39 = vmul.f32 (%p436_p0), %v1903_v34, %v1917_v54  ;;  %838 = vmatpush.msrb.mxu3 (%p436_p0), %v818_v35  ;;  %v776_v43 = vmul.f32 (%p436_p0), %v1891_v18, %v1907_v44 }
 0x159   : > { %452 = vst.msk [vmem:[%s448_s24] sm:$0x1] %vm451_vm5, %v450_v14  ;;  %554 = vmatpush.msra.mxu0 (%p436_p0), %v527_v42  ;;  %v722_v42 = vmul.f32 (%p436_p0), %v1927_v62, %v1937_v8 }
 0x15a   :  { %839 = vmatpush.msrb.mxu3 %v817_v25 }
 0x15b   :  { %555 = vmatpush.msra.mxu0 %v526_v48  ;;  %v724_v48 = vsel %vm326_vm6, %v720_v39, 0.0 }
 0x15d   :  { %556 = vmatpush.msra.mxu0 %v525_v53  ;;  %v779_v53 = vmul.f32 %v1925_v61, %v1937_v8 }
 0x15e   :  { %766 = vadd.xlane.f32.xlu0 %v765_v55  ;;  %v780_v55 = vsel %vm326_vm6, %v776_v43, 0.0 }
 0x15f   :  { %557 = vmatpush.msra.mxu0 %v524_v37  ;;  %v728_v37 = vsel %vm326_vm6, %v722_v42, 0.0 }
 0x160   :  { %v460_v17 = vld [vmem:[#allocation4] sm:$0xff]  ;;  %v461_v29 = vld [vmem:[#allocation4 + $0x8] sm:$0xff]  ;;  %v462_v28 = vld [vmem:[#allocation4 + $0x10] sm:$0xff] }
 0x161   :  { %1031 = vst.msk [vmem:[#allocation4] sm:$0xff] %vm326_vm6, %v1608_v23  ;;  %v463_v24 = vld [vmem:[#allocation4 + $0x18] sm:$0xff]  ;;  %v464_v49 = vadd.f32 %v460_v17, %v456_v46  ;;  %v465_v58 = vadd.f32 %v461_v29, %v457_v56  ;;  %558 = vmatpush.msra.mxu0 %v523_v57  ;;  %v466_v63 = vadd.f32 %v462_v28, %v458_v60  ;;  %v815_v56 = vld [vmem:[%s2382_s18] sm:$0xff]  ;;  %v781_v57 = vsel %vm326_vm6, %v777_v45, 0.0 }
 0x162   :  { %1032 = vst.msk [vmem:[#allocation4 + $0x8] sm:$0xff] %vm326_vm6, %v1608_v23  ;;  %v467_v52 = vadd.f32 %v463_v24, %v459_v36  ;;  %v778_v46 = vmul.f32 %v1913_v50, %v1929_v0  ;;  %v816_v36 = vld [vmem:[%s2382_s18 + $0x8] sm:$0xff]  ;;  %v782_v60 = vadd.f32 %v781_v57, %v780_v55 }
 0x163   :  { %1033 = vst.msk [vmem:[#allocation4 + $0x10] sm:$0xff] %vm326_vm6, %v1608_v23  ;;  %1382 = vmatmul.msk.f32.vlgmr.msrb.gmra.mxu0 %vm326_vm6, %v464_v49  ;;  %v726_v49 = vsel %vm326_vm6, %v721_v41, 0.0  ;;  %840 = vmatpush.msrb.mxu3 %v816_v36 }
 0x164   :  { %1034 = vst.msk [vmem:[#allocation4 + $0x18] sm:$0xff] %vm326_vm6, %v1608_v23  ;;  %1385 = vmatmul.msk.f32.vlgmr.msra.gmra.mxu3 %vm326_vm6, %v467_v52  ;;  %559 = vmatpush.msra.mxu0 %v522_v59  ;;  %v725_v52 = vadd.f32 %v724_v48, %v723_v47 }
 0x165   :  { %841 = vmatpush.msrb.mxu3 %v815_v56 }
 0x166   :  { %560 = vmatpush.msra.mxu0 %v521_v1  ;;  %v727_v59 = vadd.f32 %v726_v49, %v725_v52 }
 0x168   :  { %v729_v1 = vadd.f32 %v728_v37, %v727_v59  ;;  %v855_v59 = vld [vmem:[%s2384_s20 + $0x30] sm:$0xff] }
 0x16b   :  { %1383 = vmatmul.msk.f32.gmra.mxu0 %vm326_vm6, %v465_v58  ;;  %v783_v58 = vsel %vm326_vm6, %v778_v46, 0.0 }
 0x173   :  { %1384 = vmatmul.msk.f32.gmra.mxu0 %vm326_vm6, %v466_v63  ;;  %v785_v63 = vsel %vm326_vm6, %v779_v53, 0.0 }
 0x1c9   :  { %v710_v2 = vpop.xlane.xlu0 %709 }
 0x1ca   :  { %v711_v3 = vrot.slane %v710_v2, 4 }
 0x1cc   :  { %v712_v4 = vadd.f32 %v711_v3, %v710_v2  ;;  %v784_v2 = vadd.f32 %v783_v58, %v782_v60  ;;  %v730_v3 = vrot.slane %v729_v1, 4  ;;  %v856_v58 = vld [vmem:[%s2384_s20 + $0x38] sm:$0xff]  ;;  %v1491_v60 = vld [vmem:[%s2379_s15] ss:$0 sm:$0xff] }
 0x1cd   :  { %872 = vmatpush.msrb.mxu1 %v856_v58  ;;  %v938_v58 = vld [vmem:[%s2408_s29 + $0x18] sm:$0xff] }
 0x1ce   :  { %v713_v5 = vrot.slane %v712_v4, 2 }
 0x1cf   :  { %873 = vmatpush.msrb.mxu1 %v855_v59 }
 0x1d0   :  { %v714_v10 = vadd.f32 %v713_v5, %v712_v4  ;;  %v786_v4 = vadd.f32 %v785_v63, %v784_v2 }
 0x1d1   :  { %v767_v6 = vpop.xlane.xlu0 %766 }
 0x1d2   :  { %v768_v7 = vrot.slane %v767_v6, 4  ;;  %v715_v12 = vrot.slane %v714_v10, 1 }
 0x1d4   :  { %v769_v11 = vadd.f32 %v768_v7, %v767_v6  ;;  %v716_v16 = vadd.f32 %v715_v12, %v714_v10  ;;  %v731_v6 = vadd.f32 %v730_v3, %v729_v1  ;;  %v787_v7 = vrot.slane %v786_v4, 4  ;;  %v853_v1 = vld [vmem:[%s2384_s20 + $0x20] sm:$0xff]  ;;  %v852_v3 = vld [vmem:[%s2384_s20 + $0x18] sm:$0xff] }
 0x1d6   :  { %v770_v14 = vrot.slane %v769_v11, 2  ;;  %1433 = vpush %v716_v16  ;;  %v788_v10 = vadd.f32 %v787_v7, %v786_v4 }
 0x1d8   :  { %v771_v17 = vadd.f32 %v770_v14, %v769_v11  ;;  %v789_v14 = vrot.slane %v788_v10, 2 }
 0x1da   :  { %v772_v21 = vrot.slane %v771_v17, 1 }
 0x1dc   :  { %v773_v22 = vadd.f32 %v772_v21, %v771_v17 }
 0x1de   :  { %1435 = vpush %v773_v22 }
 0x1e0   :  { %v505_v13 = vpop.f32.mrf.mxu0 }
 0x1e1   :  { %v506_v15 = vadd.f32 %v1490_v9, %v505_v13 }
 0x1e3   :  { %v517_v20 = vmax.f32 %v506_v15, 0.0 }
 0x1e5   :  { %1386 = vmatmul.msk.f32.vlgmr.msra.gmra.mxu0 %vm212_vm12, %v517_v20  ;;  %v752_v20 = vlaneseq }
 0x1e7   :  { %v514_v28 = vpop.f32.mrf.mxu3 }
 0x1e8   :  { %v508_v27 = vpop.f32.mrf.mxu0  ;;  %v515_v32 = vadd.f32 %v1490_v9, %v514_v28 }
 0x1e9   :  { %v509_v29 = vadd.f32 %v1490_v9, %v508_v27  ;;  %v790_v27 = vadd.f32 %v789_v14, %v788_v10 }
 0x1ea   :  { %v520_v24 = vmax.f32 %v515_v32, 0.0 }
 0x1eb   :  { %v518_v30 = vmax.f32 %v509_v29, 0.0  ;;  %v791_v39 = vrot.slane %v790_v27, 1 }
 0x1ed   :  { %1387 = vmatmul.msk.f32.gmra.mxu0 %vm212_vm12, %v518_v30  ;;  %v792_v47 = vadd.f32 %v791_v39, %v790_v27  ;;  %v849_v27 = vld [vmem:[%s2384_s20] sm:$0xff] }
 0x1f0   :  { %v511_v31 = vpop.f32.mrf.mxu0 }
 0x1f1   :  { %v512_v26 = vadd.f32 %v1490_v9, %v511_v31  ;;  %v732_v9 = vrot.slane %v731_v6, 2 }
 0x1f3   :  { %v519_v38 = vmax.f32 %v512_v26, 0.0  ;;  %v733_v13 = vadd.f32 %v732_v9, %v731_v6 }
 0x1f5   :  { %1388 = vmatmul.msk.f32.gmra.mxu0 %vm212_vm12, %v519_v38  ;;  %v734_v22 = vrot.slane %v733_v13, 1  ;;  %v753_v38 = vshrl.u32 %v752_v20, 7 }
 0x1f7   :  { %v735_v40 = vadd.f32 %v734_v22, %v733_v13  ;;  %vm754_vm15 = vcmp.eq.s32.totalorder %v753_v38, 0  ;;  %vm809_vm2 = vcmp.eq.s32.totalorder %v753_v38, 1 }
 0x1f8   :  { %v1390_v48 = vsel %vm754_vm15, 1.0, %v1608_v23  ;;  %v1391_v53 = vsel %vm809_vm2, 1.0, %v1608_v23  ;;  %v854_v23 = vld [vmem:[%s2384_s20 + $0x28] sm:$0xff] }
 0x1f9   :  { %874 = vmatpush.msrb.mxu1 %v854_v23 }
 0x1fb   :  { %875 = vmatpush.msrb.mxu1 %v853_v1 }
 0x1fd   :  { %1389 = vmatmul.msk.f32.gmra.mxu0 %vm212_vm12, %v520_v24  ;;  %876 = vmatpush.msrb.mxu1 %v852_v3  ;;  %v940_v3 = vld [vmem:[%s2408_s29 + $0x28] sm:$0xff] }
 0x207   :  { %s1434_s6 = spop %1433 }
 0x208   :  { %s718_s2 = smax.f32 %s1610_s25, %s1434_s6 }
 0x209   :  { %v736_v5 = vstv %s718_s2 }
 0x20a   :  { %1497 = vrcp.f32 %v736_v5  ;;  %v746_v16 = vand.u32 2147483647, %v736_v5  ;;  %v748_v17 = vand.u32 2147483648, %v736_v5  ;;  %vm742_vm8 = vweird.f32 %v736_v5 }
 0x20c   :  { %vm747_vm11 = vcmp.eq.f32.partialorder %v746_v16, 8.507059e+37  ;;  %v749_v26 = vor.u32 1.1754944e-38, %v748_v17  ;;  %v1492_v16 = vld [vmem:[%s2383_s19] ss:$0 sm:$0xff] }
 0x20f   :  { %s1436_s18 = spop %1435 }
 0x210   :  { %s775_s27 = smax.f32 %s1610_s25, %s1436_s18  ;;  %v1498_v12 = vpop.eup %1497 }
 0x211   :  { %v793_v11 = vstv %s775_s27  ;;  %v738_v15 = vmul.f32 %v1498_v12, %v736_v5  ;;  %vm743_vm9 = vweird.f32 %v1498_v12 }
 0x212   :  { %1499 = vrcp.f32 %v793_v11  ;;  %vm2058_vm10 = vmor %vm742_vm8, %vm743_vm9  ;;  %vm799_vm13 = vweird.f32 %v793_v11  ;;  %v803_v24 = vand.u32 2147483647, %v793_v11  ;;  %v805_v35 = vand.u32 2147483648, %v793_v11 }
 0x213   :  { %v739_v21 = vsub.f32 1.0, %v738_v15  ;;  %v851_v15 = vld [vmem:[%s2384_s20 + $0x10] sm:$0xff] }
 0x214   :  { %v806_v45 = vor.u32 1.1754944e-38, %v805_v35  ;;  %vm804_vm3 = vcmp.eq.f32.partialorder %v803_v24, 8.507059e+37  ;;  %877 = vmatpush.msrb.mxu1 %v851_v15 }
 0x215   :  { %v740_v30 = vmul.f32 %v1498_v12, %v739_v21  ;;  %v850_v21 = vld [vmem:[%s2384_s20 + $0x8] sm:$0xff] }
 0x216   :  { %878 = vmatpush.msrb.mxu1 %v850_v21 }
 0x217   :  { %v741_v32 = vadd.f32 %v1498_v12, %v740_v30  ;;  %v1611_v30 = vmov 32.0  }
 0x218   :  { %v1500_v29 = vpop.eup %1499  ;;  %879 = vmatpush.msrb.mxu1 %v849_v27  ;;  %1501 = vrcp.f32 %v1611_v30 }
 0x219   :  { %v795_v28 = vmul.f32 %v1500_v29, %v793_v11  ;;  %vm800_vm14 = vweird.f32 %v1500_v29  ;;  %v745_v41 = vsel %vm2058_vm10, %v1498_v12, %v741_v32 }
 0x21a   :  { %v750_v43 = vsel %vm747_vm11, %v749_v26, %v745_v41  ;;  %vm801_vm0 = vmor %vm799_vm13, %vm800_vm14 }
 0x21b   :  { %v796_v25 = vsub.f32 1.0, %v795_v28  ;;  %v751_v36 = vmul.f32 %v750_v43, %v735_v40  ;;  %v935_v40 = vld [vmem:[%s2408_s29] sm:$0xff] }
 0x21d   :  { %v797_v42 = vmul.f32 %v1500_v29, %v796_v25  ;;  %v757_v55 = vmul.f32 %v1390_v48, %v751_v36  ;;  %v1394_v25 = vld [vmem:[%s2374_s10 + $0x8] sm:$0xff] }
 0x21e   :  { %v1502_v31 = vpop.eup %1501  ;;  %989 = vmatpush.msra.mxu3 %v1394_v25 }
 0x21f   :  { %v798_v46 = vadd.f32 %v1500_v29, %v797_v42  ;;  %v589_v26 = vmul.f32 32.0, %v1502_v31  ;;  %vm593_vm7 = vweird.f32 %v1502_v31 }
 0x221   :  { %v802_v49 = vsel %vm801_vm0, %v1500_v29, %v798_v46  ;;  %v590_v28 = vsub.f32 1.0, %v589_v26 }
 0x222   :  { %v807_v52 = vsel %vm804_vm3, %v806_v45, %v802_v49  ;;  %v936_v45 = vld [vmem:[%s2408_s29 + $0x8] sm:$0xff] }
 0x223   :  { %v808_v56 = vmul.f32 %v807_v52, %v792_v47  ;;  %v591_v38 = vmul.f32 %v1502_v31, %v590_v28  ;;  %v937_v52 = vld [vmem:[%s2408_s29 + $0x10] sm:$0xff] }
 0x225   :  { %v812_v37 = vmul.f32 %v1391_v53, %v808_v56  ;;  %v592_v32 = vadd.f32 %v1502_v31, %v591_v38 }
 0x227   :  { %v813_v57 = vadd.f32 %v812_v37, %v757_v55  ;;  %v2102_v24 = vsel %vm593_vm7, %v1502_v31, %v592_v32 }
 0x229   :  { %1392 = vmatmul.msk.f32.vlgmr.msrb.gmra.mxu3 %vm326_vm6, %v813_v57 }
 0x231   :  { %1396 = vmatmul.msk.f32.vlgmr.msra.gmra.mxu3 %vm348_vm1, %v935_v40 }
 0x239   :  { %1397 = vmatmul.msk.f32.gmra.mxu3 %vm348_vm1, %v936_v45 }
 0x241   :  { %1398 = vmatmul.msk.f32.gmra.mxu3 %vm348_vm1, %v937_v52 }
 0x249   :  { %1399 = vmatmul.msk.f32.gmra.mxu3 %vm348_vm1, %v938_v58 }
 0x262   :  { %v562_v63 = vpop.f32.mrf.mxu0 }
 0x263   :  { %v563_v2 = vadd.f32 %v1491_v60, %v562_v63 }
 0x265   :  { %v576_v4 = vsel %vm326_vm6, %v563_v2, 0.0 }
 0x266   :  { %577 = vadd.xlane.f32.xlu1 %v576_v4  ;;  %v941_v4 = vld [vmem:[%s2408_s29 + $0x30] sm:$0xff] }
 0x26a   :  { %v565_v5 = vpop.f32.mrf.mxu0 }
 0x26b   :  { %v566_v6 = vadd.f32 %v1491_v60, %v565_v5  ;;  %v942_v5 = vld [vmem:[%s2408_s29 + $0x38] sm:$0xff] }
 0x26d   :  { %v579_v7 = vsel %vm326_vm6, %v566_v6, 0.0 }
 0x26e   :  { %580 = vadd.xlane.f32.xlu1 %v579_v7 }
 0x272   :  { %v568_v9 = vpop.f32.mrf.mxu0 }
 0x273   :  { %v569_v10 = vadd.f32 %v1491_v60, %v568_v9 }
 0x275   :  { %v582_v11 = vsel %vm326_vm6, %v569_v10, 0.0 }
 0x276   :  { %583 = vadd.xlane.f32.xlu2 %v582_v11 }
 0x27a   :  { %v571_v12 = vpop.f32.mrf.mxu0 }
 0x27b   :  { %v572_v13 = vadd.f32 %v1491_v60, %v571_v12 }
 0x27d   :  { %v585_v14 = vsel %vm326_vm6, %v572_v13, 0.0 }
 0x27e   :  { %586 = vadd.xlane.f32.xlu2 %v585_v14 }
 0x2ac   :  { %v843_v17 = vpop.f32.mrf.mxu3 }
 0x2ad   :  { %v844_v20 = vadd.f32 %v1492_v16, %v843_v17 }
 0x2af   :  { %v847_v22 = vmul.f32 0.1, %v844_v20  ;;  %vm846_vm4 = vcmp.gt.f32.partialorder %v844_v20, 0.0 }
 0x2b1   :  { %v848_v29 = vsel %vm846_vm4, %v844_v20, %v847_v22 }
 0x2b2   :  { %1393 = vmatmul.msk.f32.vlgmr.msrb.gmra.mxu1 %vm212_vm12, %v848_v29 }
 0x2d9   :  { %v578_v35 = vpop.xlane.xlu1 %577 }
 0x2da   :  { %v595_v39 = vmul.f32 %v2102_v24, %v578_v35  ;;  %v2172_v35 = vld [vmem:[%s2380_s16] ss:$0 sm:$0xff] }
 0x2dc   :  { %v2112_v41 = vsub.f32 %v563_v2, %v595_v39  ;;  %v939_v2 = vld [vmem:[%s2408_s29 + $0x20] sm:$0xff]  ;;  %s1601_s29 = smov 0  }
 0x2dd   :  { %1400 = vmatmul.msk.f32.gmra.mxu3 %vm348_vm1, %v939_v2 }
 0x2de   :  { %v603_v42 = vmul.f32 %v2112_v41, %v2112_v41 }
 0x2e0   :  { %v607_v43 = vsel %vm326_vm6, %v603_v42, 0.0 }
 0x2e1   :  { %608 = vadd.xlane.f32.xlu0 %v607_v43  ;;  %v581_v46 = vpop.xlane.xlu1 %580  ;;  %v2180_v43 = vld [vmem:[%s2381_s17] ss:$0 sm:$0xff] }
 0x2e2   :  { %v596_v36 = vmul.f32 %v2102_v24, %v581_v46 }
 0x2e4   :  { %v2122_v47 = vsub.f32 %v566_v6, %v596_v36 }
 0x2e5   :  { %1401 = vmatmul.msk.f32.gmra.mxu3 %vm348_vm1, %v940_v3 }
 0x2e6   :  { %v604_v48 = vmul.f32 %v2122_v47, %v2122_v47 }
 0x2e8   :  { %v610_v49 = vsel %vm326_vm6, %v604_v48, 0.0 }
 0x2e9   :  { %v584_v53 = vpop.xlane.xlu2 %583  ;;  %611 = vadd.xlane.f32.xlu1 %v610_v49 }
 0x2ea   :  { %v597_v55 = vmul.f32 %v2102_v24, %v584_v53 }
 0x2ec   :  { %v2132_v56 = vsub.f32 %v569_v10, %v597_v55  ;;  %v1494_v10 = vld [vmem:[%s2385_s21] ss:$0 sm:$0xff] }
 0x2ed   :  { %1402 = vmatmul.msk.f32.gmra.mxu3 %vm348_vm1, %v941_v4 }
 0x2ee   :  { %v605_v37 = vmul.f32 %v2132_v56, %v2132_v56 }
 0x2f0   :  { %v613_v57 = vsel %vm326_vm6, %v605_v37, 0.0 }
 0x2f1   :  { %614 = vadd.xlane.f32.xlu2 %v613_v57  ;;  %v587_v59 = vpop.xlane.xlu2 %586 }
 0x2f2   :  { %v598_v60 = vmul.f32 %v2102_v24, %v587_v59 }
 0x2f4   :  { %v2142_v23 = vsub.f32 %v572_v13, %v598_v60  ;;  %v2196_v60 = vld [vmem:[%s2375_s11 + $0x1] ss:$0 sm:$0xff]  ;;  %s1612_s11 = smov 32  }
 0x2f5   :  { %1403 = vmatmul.msk.f32.gmra.mxu3 %vm348_vm1, %v942_v5 }
 0x2f6   :  { %v606_v63 = vmul.f32 %v2142_v23, %v2142_v23 }
 0x2f8   :  { %v616_v1 = vsel %vm326_vm6, %v606_v63, 0.0  ;;  %v991_v63 = vpop.f32.mrf.mxu3 }
 0x2f9   :  { %617 = vadd.xlane.f32.xlu0 %v616_v1 }
 0x32f   :  { %v881_v12 = vpop.f32.mrf.mxu1 }
 0x330   :  { %v882_v17 = vadd.f32 %v1494_v10, %v881_v12 }
 0x332   :  { %v885_v22 = vmul.f32 0.1, %v882_v17  ;;  %vm884_vm1 = vcmp.gt.f32.partialorder %v882_v17, 0.0 }
 0x334   :  { %v886_v38 = vsel %vm884_vm1, %v882_v17, %v885_v22  ;;  %v994_v17 = vpop.f32.mrf.mxu3 }
 0x335   :  { %v2175_v42 = vperm.slane %v886_v38, 0  ;;  %v2182_v45 = vperm.slane %v886_v38, 1 }
 0x337   :  { %v889_v37 = vmul.f32 %v1893_v19, %v2175_v42  ;;  %v898_v59 = vmul.f32 %v1891_v18, %v2182_v45  ;;  %v992_v19 = vadd.f32 %v2196_v60, %v991_v63 }
 0x354   :  { %v609_v6 = vpop.xlane.xlu0 %608 }
 0x355   :  { %v619_v7 = vmul.f32 %v609_v6, %v2102_v24 }
 0x357   :  { %v623_v9 = vadd.f32 1e-05, %v619_v7  ;;  %v902_v7 = vadd.f32 %v898_v59, %v889_v37 }
 0x359   :  { %1503 = vrsqrt.f32 %v623_v9  ;;  %vm633_vm9 = vweird.f32 %v623_v9 }
 0x35c   :  { %v612_v11 = vpop.xlane.xlu1 %611 }
 0x35d   :  { %v620_v13 = vmul.f32 %v612_v11, %v2102_v24 }
 0x35f   :  { %v1504_v14 = vpop.eup %1503  ;;  %v624_v15 = vadd.f32 1e-05, %v620_v13 }
 0x360   :  { %v628_v16 = vmul.f32 %v1504_v14, %v623_v9  ;;  %vm634_vm8 = vweird.f32 %v1504_v14  ;;  %v1015_v9 = vmax.f32 %v992_v19, 0.0 }
 0x361   :  { %1505 = vrsqrt.f32 %v624_v15  ;;  %vm635_vm10 = vmor %vm633_vm9, %vm634_vm8  ;;  %vm643_vm13 = vweird.f32 %v624_v15 }
 0x362   :  { %v629_v20 = vmul.f32 %v1504_v14, %v628_v16  ;;  %1023 = vst.msk [vmem:[#allocation3] sm:$0xff] %vm326_vm6, %v1015_v9  ;;  %v899_v16 = vmul.f32 %v1901_v33, %v2182_v45 }
 0x364   :  { %v630_v21 = vmul.f32 0.5, %v629_v20  ;;  %v615_v27 = vpop.xlane.xlu2 %614 }
 0x365   :  { %v621_v29 = vmul.f32 %v615_v27, %v2102_v24 }
 0x366   :  { %v631_v30 = vsub.f32 1.5, %v630_v21 }
 0x367   :  { %v1506_v31 = vpop.eup %1505  ;;  %v625_v26 = vadd.f32 1e-05, %v621_v29 }
 0x368   :  { %v632_v28 = vmul.f32 %v1504_v14, %v631_v30  ;;  %v638_v32 = vmul.f32 %v1506_v31, %v624_v15  ;;  %vm644_vm11 = vweird.f32 %v1506_v31 }
 0x369   :  { %1507 = vrsqrt.f32 %v625_v26  ;;  %vm645_vm14 = vmor %vm643_vm13, %vm644_vm11  ;;  %vm653_vm2 = vweird.f32 %v625_v26  ;;  %vm926_vm11 = vcmask 523520  }
 0x36a   :  { %v636_v25 = vsel %vm635_vm10, %v1504_v14, %v632_v28  ;;  %v639_v40 = vmul.f32 %v1506_v31, %v638_v32 }
 0x36b   :  { %v667_v39 = vmul.f32 %v636_v25, %v2112_v41 }
 0x36c   :  { %v640_v46 = vmul.f32 0.5, %v639_v40  ;;  %v618_v36 = vpop.xlane.xlu0 %617 }
 0x36d   :  { %v674_v48 = vmul.f32 %v2172_v35, %v667_v39  ;;  %v622_v49 = vmul.f32 %v618_v36, %v2102_v24  ;;  %v997_v39 = vpop.f32.mrf.mxu3 }
 0x36e   :  { %v641_v52 = vsub.f32 1.5, %v640_v46  ;;  %v998_v36 = vadd.f32 %v2196_v60, %v997_v39 }
 0x36f   :  { %v1508_v53 = vpop.eup %1507  ;;  %v2186_v55 = vadd.f32 1e-05, %v622_v49  ;;  %v681_v41 = vadd.f32 %v2180_v43, %v674_v48 }
 0x370   :  { %v642_v57 = vmul.f32 %v1506_v31, %v641_v52  ;;  %v648_v58 = vmul.f32 %v1508_v53, %v625_v26  ;;  %vm654_vm0 = vweird.f32 %v1508_v53 }
 0x371   :  { %1509 = vrsqrt.f32 %v2186_v55  ;;  %vm685_vm15 = vcmp.gt.f32.partialorder %v681_v41, 0.0  ;;  %v689_v1 = vmul.f32 0.1, %v681_v41  ;;  %vm655_vm3 = vmor %vm653_vm2, %vm654_vm0  ;;  %vm663_vm1 = vweird.f32 %v2186_v55 }
 0x372   :  { %v646_v2 = vsel %vm645_vm14, %v1506_v31, %v642_v57  ;;  %v649_v3 = vmul.f32 %v1508_v53, %v648_v58 }
 0x373   :  { %v668_v4 = vmul.f32 %v646_v2, %v2122_v47  ;;  %v693_v5 = vsel %vm685_vm15, %v681_v41, %v689_v1  ;;  %v890_v47 = vmul.f32 %v1903_v34, %v2175_v42  ;;  %v995_v34 = vadd.f32 %v2196_v60, %v994_v17 }
 0x374   :  { %v650_v6 = vmul.f32 0.5, %v649_v3  ;;  %v697_v18 = vadd.f32 %v693_v5, %v1907_v44 }
 0x375   :  { %v675_v10 = vmul.f32 %v2172_v35, %v668_v4  ;;  %v1016_v30 = vmax.f32 %v995_v34, 0.0  ;;  %v903_v28 = vadd.f32 %v899_v16, %v890_v47  ;;  %v1000_v57 = vpop.f32.mrf.mxu3 }
 0x376   :  { %v651_v11 = vsub.f32 1.5, %v650_v6  ;;  %v2203_v12 = vadd.f32 %v902_v7, %v697_v18  ;;  %v1001_v58 = vadd.f32 %v2196_v60, %v1000_v57 }
 0x377   :  { %v1510_v13 = vpop.eup %1509  ;;  %v682_v14 = vadd.f32 %v2180_v43, %v675_v10  ;;  %1024 = vst.msk [vmem:[#allocation3 + $0x8] sm:$0xff] %vm326_vm6, %v1016_v30 }
 0x378   :  { %v652_v15 = vmul.f32 %v1508_v53, %v651_v11  ;;  %v658_v44 = vmul.f32 %v1510_v13, %v2186_v55  ;;  %931 = vst.msk [vmem:[#allocation2] sm:$0xff] %vm326_vm6, %v2203_v12  ;;  %914 = vrot.lane.b32.xlu1 %v2203_v12, %s1612_s11  ;;  %vm664_vm7 = vweird.f32 %v1510_v13  ;;  %v1018_v63 = vmax.f32 %v1001_v58, 0.0 }
 0x379   :  { %vm686_vm4 = vcmp.gt.f32.partialorder %v682_v14, 0.0  ;;  %v690_v20 = vmul.f32 0.1, %v682_v14  ;;  %vm665_vm8 = vmor %vm663_vm1, %vm664_vm7 }
 0x37a   :  { %v656_v21 = vsel %vm655_vm3, %v1508_v53, %v652_v15  ;;  %v659_v22 = vmul.f32 %v1510_v13, %v658_v44  ;;  %v1017_v53 = vmax.f32 %v998_v36, 0.0  ;;  %1026 = vst.msk [vmem:[#allocation3 + $0x18] sm:$0xff] %vm326_vm6, %v1018_v63 }
 0x37b   :  { %v669_v27 = vmul.f32 %v656_v21, %v2132_v56  ;;  %v694_v29 = vsel %vm686_vm4, %v682_v14, %v690_v20  ;;  %v900_v56 = vmul.f32 %v1913_v50, %v2182_v45 }
 0x37c   :  { %v660_v31 = vmul.f32 0.5, %v659_v22  ;;  %v698_v26 = vadd.f32 %v694_v29, %v1917_v54  ;;  %v891_v54 = vmul.f32 %v1915_v51, %v2175_v42  ;;  %1025 = vst.msk [vmem:[#allocation3 + $0x10] sm:$0xff] %vm326_vm6, %v1017_v53 }
 0x37d   :  { %v676_v38 = vmul.f32 %v2172_v35, %v669_v27 }
 0x37e   :  { %v661_v33 = vsub.f32 1.5, %v660_v31  ;;  %v2221_v32 = vadd.f32 %v903_v28, %v698_v26  ;;  %v904_v41 = vadd.f32 %v900_v56, %v891_v54 }
 0x37f   :  { %v683_v25 = vadd.f32 %v2180_v43, %v676_v38 }
 0x380   :  { %v662_v40 = vmul.f32 %v1510_v13, %v661_v33  ;;  %916 = vrot.lane.b32.xlu2 %v2221_v32, %s1612_s11  ;;  %932 = vst.msk [vmem:[#allocation2 + $0x8] sm:$0xff] %vm326_vm6, %v2221_v32 }
 0x381   :  { %vm687_vm9 = vcmp.gt.f32.partialorder %v683_v25, 0.0  ;;  %v691_v46 = vmul.f32 0.1, %v683_v25 }
 0x382   :  { %v666_v48 = vsel %vm665_vm8, %v1510_v13, %v662_v40 }
 0x383   :  { %v670_v49 = vmul.f32 %v666_v48, %v2142_v23  ;;  %v695_v52 = vsel %vm687_vm9, %v683_v25, %v691_v46  ;;  %v892_v23 = vmul.f32 %v1927_v62, %v2175_v42 }
 0x384   :  { %v699_v55 = vadd.f32 %v695_v52, %v1929_v0  ;;  %v901_v0 = vmul.f32 %v1925_v61, %v2182_v45  ;;  %v1003_v61 = vpop.f32.mrf.mxu3 }
 0x385   :  { %v677_v37 = vmul.f32 %v2172_v35, %v670_v49  ;;  %v1004_v62 = vadd.f32 %v2196_v60, %v1003_v61 }
 0x386   :  { %v2238_v51 = vadd.f32 %v904_v41, %v699_v55  ;;  %v905_v1 = vadd.f32 %v901_v0, %v892_v23 }
 0x387   :  { %v684_v50 = vadd.f32 %v2180_v43, %v677_v37  ;;  %v1019_v42 = vmax.f32 %v1004_v62, 0.0 }
 0x388   :  { %933 = vst.msk [vmem:[#allocation2 + $0x10] sm:$0xff] %vm326_vm6, %v2238_v51  ;;  %918 = vrot.lane.b32.xlu0 %v2238_v51, %s1612_s11 }
 0x389   :  { %vm688_vm10 = vcmp.gt.f32.partialorder %v684_v50, 0.0  ;;  %v692_v35 = vmul.f32 0.1, %v684_v50  ;;  %1027 = vst.msk [vmem:[#allocation3 + $0x20] sm:$0xff] %vm326_vm6, %v1019_v42 }
 0x38b   :  { %v696_v59 = vsel %vm688_vm10, %v684_v50, %v692_v35 }
 0x38c   :  { %v700_v43 = vadd.f32 %v696_v59, %v1937_v8  ;;  %v1006_v45 = vpop.f32.mrf.mxu3 }
 0x38d   :  { %v1007_v8 = vadd.f32 %v2196_v60, %v1006_v45 }
 0x38e   :  { %v2252_v2 = vadd.f32 %v905_v1, %v700_v43 }
 0x38f   :  { %v1020_v3 = vmax.f32 %v1007_v8, 0.0 }
 0x390   :  { %934 = vst.msk [vmem:[#allocation2 + $0x18] sm:$0xff] %vm326_vm6, %v2252_v2  ;;  %920 = vrot.lane.b32.xlu2 %v2252_v2, %s1612_s11 }
 0x391   :  { %1028 = vst.msk [vmem:[#allocation3 + $0x28] sm:$0xff] %vm326_vm6, %v1020_v3 }
 0x394   :  { %v1009_v19 = vpop.f32.mrf.mxu3 }
 0x395   :  { %v1010_v4 = vadd.f32 %v2196_v60, %v1009_v19 }
 0x397   :  { %v1021_v5 = vmax.f32 %v1010_v4, 0.0 }
 0x399   :  { %1029 = vst.msk [vmem:[#allocation3 + $0x30] sm:$0xff] %vm326_vm6, %v1021_v5 }
 0x39c   :  { %v1012_v6 = vpop.f32.mrf.mxu3 }
 0x39d   :  { %v1013_v18 = vadd.f32 %v2196_v60, %v1012_v6 }
 0x39f   :  { %v1022_v7 = vmax.f32 %v1013_v18, 0.0 }
 0x3a1   :  { %1030 = vst.msk [vmem:[#allocation3 + $0x38] sm:$0xff] %vm326_vm6, %v1022_v7 }
 0x3da   :  { %v917_v9 = vpop.permute.xlu2 %916 }
 0x3db   :  { %928 = vst.msk [vmem:[#allocation11 + $0x8] sm:$0xff] %vm926_vm11, %v917_v9 }
 0x3ea   :  { %v921_v10 = vpop.permute.xlu2 %920  ;;  %v915_v11 = vpop.permute.xlu1 %914 }
 0x3eb   :  { %930 = vst.msk [vmem:[#allocation11 + $0x18] sm:$0xff] %vm926_vm11, %v921_v10 }
 0x3ec   :  { %927 = vst.msk [vmem:[#allocation11] sm:$0xff] %vm926_vm11, %v915_v11 }
 0x3fa   :  { %v919_v13 = vpop.permute.xlu0 %918 }
 0x3fb   :  { %929 = vst.msk [vmem:[#allocation11 + $0x10] sm:$0xff] %vm926_vm11, %v919_v13 }
 0x3fc LB: > { %s1041_s7 = sld [smem:[#allocation5 + %s1603_s29]]  ;;  %s1045_s10 = scalar_lea.vmem [#allocation3], %s1603_s29  ;;  %s1603_s29 = sphi %s1601_s29, %s1040_s29  }
 0x3fd   : > { %s1042_s26 = sld [smem:[#allocation8 + %s1603_s29]]  ;;  %v1046_v60 = vld [vmem:[%s1045_s10] sm:$0x1]  ;;  %s1040_s29 = sadd.s32 1, %s1603_s29  }
 0x3fe   : > { %p1037_p1 = scmp.ge.s32.totalorder %s1040_s29, 64  }
 0x3ff   :  { %v1408_v17 = vld [vmem:[%s2376_s12 + $0x38] sm:$0xff] (%p1037_p1)  ;;  %v1407_v20 = vld [vmem:[%s2376_s12 + $0x30] sm:$0xff] (%p1037_p1)  ;;  %s1404_s8 = sld [smem:[#allocation10 + $0x1]] (%p1037_p1)  ;;  %v1406_v34 = vld [vmem:[%s2376_s12 + $0x28] sm:$0xff] (%p1037_p1)  ;;  %s1328_s18 = sshll.u32 (%p1037_p1), %s2386_s22, 4  ;;  %s1329_s18 = int_to_ptr.hbm [resolvable:$true] %s1328_s18 }
 0x400   :  { %1103 = vmatpush.msra.mxu1 (%p1037_p1), %v1408_v17  ;;  %v1405_v21 = vld [vmem:[%s2376_s12 + $0x20] sm:$0xff] (%p1037_p1)  ;;  %v1421_v22 = vld [vmem:[%s2378_s14 + $0x78] sm:$0xff] (%p1037_p1)  ;;  %v1420_v27 = vld [vmem:[%s2378_s14 + $0x70] sm:$0xff] (%p1037_p1)  ;;  %s1615_s27 = smov (%p1037_p1), 128   ;;  %s1616_s21 = smov (%p1037_p1), 8  }
 0x401   :  { %1158 = vmatpush.msrb.mxu2 (%p1037_p1), %v1421_v22  ;;  %v1419_v29 = vld [vmem:[%s2378_s14 + $0x68] sm:$0xff] (%p1037_p1)  ;;  %v1418_v28 = vld [vmem:[%s2378_s14 + $0x60] sm:$0xff] (%p1037_p1)  ;;  %v1417_v33 = vld [vmem:[%s2378_s14 + $0x58] sm:$0xff] (%p1037_p1) }
 0x402   : > { %s1043_s30 = scalar_lea.vmem [#allocation2], %s1041_s7  ;;  %1104 = vmatpush.msra.mxu1 (%p1037_p1), %v1407_v20  ;;  %v1416_v52 = vld [vmem:[%s2378_s14 + $0x50] sm:$0xff] (%p1037_p1)  ;;  %v1415_v53 = vld [vmem:[%s2378_s14 + $0x48] sm:$0xff] (%p1037_p1)  ;;  %v1414_v55 = vld [vmem:[%s2378_s14 + $0x40] sm:$0xff] (%p1037_p1) }
 0x403   : > { %v1044_v14 = vld [vmem:[%s1043_s30] sm:$0x1]  ;;  %s1049_s4 = scalar_lea.vmem [#allocation4], %s1042_s26  ;;  %1159 = vmatpush.msrb.mxu2 (%p1037_p1), %v1420_v27  ;;  %v1511_v41 = vld [vmem:[%s2377_s13 + $0x1] ss:$0 sm:$0xff] (%p1037_p1) }
 0x404   : > { %v1047_v47 = vadd.f32 %v1046_v60, %v1044_v14  ;;  %v1050_v15 = vld [vmem:[%s1049_s4] sm:$0x1]  ;;  %1105 = vmatpush.msra.mxu1 (%p1037_p1), %v1406_v34  ;;  %v1512_v62 = vld [vmem:[%s2379_s15 + $0x1] ss:$0 sm:$0xff] (%p1037_p1) }
 0x405   :  { %s1055_s19 = sadd.f32 (%p1037_p1), 1.0, %s1404_s8  ;;  %1160 = vmatpush.msrb.mxu2 (%p1037_p1), %v1419_v29 }
 0x406   : > { %v1048_v44 = vmax.f32 %v1047_v47, 0.0  ;;  %1039 = sbr.rel (!%p1037_p1) target bundleno = 1020 (0x3fc), region = 159  ;;  %1106 = vmatpush.msra.mxu1 (%p1037_p1), %v1405_v21 }
 0x407   :  { %v1056_v30 = vstv (%p1037_p1), %s1055_s19  ;;  %1161 = vmatpush.msrb.mxu2 (%p1037_p1), %v1418_v28 }
 0x408   : > { %v1051_v16 = vadd.f32 %v1050_v15, %v1048_v44  ;;  %v1057_v26 = vmul.f32 (%p1037_p1), %v1056_v30, %v2203_v12  ;;  %v1058_v25 = vmul.f32 (%p1037_p1), %v1056_v30, %v2221_v32  ;;  %v1059_v56 = vmul.f32 (%p1037_p1), %v1056_v30, %v2238_v51 }
 0x409   :  { %1162 = vmatpush.msrb.mxu2 (%p1037_p1), %v1417_v33  ;;  %v1060_v36 = vmul.f32 (%p1037_p1), %v1056_v30, %v2252_v2 }
 0x40a   : > { %1053 = vst.msk [vmem:[%s1049_s4] sm:$0x1] %vm451_vm5, %v1051_v16 }
 0x40b   :  { %1163 = vmatpush.msrb.mxu2 %v1416_v52 }
 0x40d   :  { %1164 = vmatpush.msrb.mxu2 %v1415_v53 }
 0x40f   :  { %1165 = vmatpush.msrb.mxu2 %v1414_v55 }
 0x411   :  { %v1061_v31 = vld [vmem:[#allocation4] sm:$0xff]  ;;  %v1062_v40 = vld [vmem:[#allocation4 + $0x8] sm:$0xff]  ;;  %v1063_v39 = vld [vmem:[#allocation4 + $0x10] sm:$0xff] }
 0x412   :  { %v1065_v38 = vadd.f32 %v1061_v31, %v1057_v26  ;;  %v1066_v54 = vadd.f32 %v1062_v40, %v1058_v25  ;;  %v1067_v46 = vadd.f32 %v1063_v39, %v1059_v56  ;;  %v1064_v48 = vld [vmem:[#allocation4 + $0x18] sm:$0xff] }
 0x413   :  { %v1068_v49 = vadd.f32 %v1064_v48, %v1060_v36 }
 0x414   :  { %1410 = vmatmul.msk.f32.vlgmr.msra.gmra.mxu1 %vm326_vm6, %v1065_v38 }
 0x41c   :  { %1411 = vmatmul.msk.f32.gmra.mxu1 %vm326_vm6, %v1066_v54 }
 0x424   :  { %1412 = vmatmul.msk.f32.gmra.mxu1 %vm326_vm6, %v1067_v46 }
 0x42c   :  { %1413 = vmatmul.msk.f32.gmra.mxu1 %vm326_vm6, %v1068_v49 }
 0x491   :  { %v1108_v37 = vpop.f32.mrf.mxu1 }
 0x492   :  { %v1109_v50 = vadd.f32 %v1511_v41, %v1108_v37 }
 0x494   :  { %v1120_v23 = vmax.f32 %v1109_v50, 0.0 }
 0x496   :  { %1423 = vmatmul.msk.f32.vlgmr.msrb.gmra.mxu2 %vm212_vm12, %v1120_v23 }
 0x499   :  { %v1111_v0 = vpop.f32.mrf.mxu1 }
 0x49a   :  { %v1112_v57 = vadd.f32 %v1511_v41, %v1111_v0  ;;  %v1513_v0 = vld [vmem:[%s2380_s16 + $0x1] ss:$0 sm:$0xff]  ;;  %s1613_s16 = smov 64  }
 0x49c   :  { %v1121_v35 = vmax.f32 %v1112_v57, 0.0 }
 0x49e   :  { %1424 = vmatmul.msk.f32.gmra.mxu2 %vm212_vm12, %v1121_v35 }
 0x4a1   :  { %v1114_v58 = vpop.f32.mrf.mxu1 }
 0x4a2   :  { %v1115_v59 = vadd.f32 %v1511_v41, %v1114_v58 }
 0x4a4   :  { %v1122_v63 = vmax.f32 %v1115_v59, 0.0  ;;  %v1514_v59 = vld [vmem:[%s2381_s17 + $0x1] ss:$0 sm:$0xff]  ;;  %s1614_s17 = smov [#allocation11]  }
 0x4a5   :  { %s1326_s6 = sshll.u32 %s1614_s17, 4  ;;  %s1327_s6 = int_to_ptr.vmem [resolvable:$true] %s1326_s6 }
 0x4a6   :  { %1425 = vmatmul.msk.f32.gmra.mxu2 %vm212_vm12, %v1122_v63 }
 0x4a9   :  { %v1117_v43 = vpop.f32.mrf.mxu1 }
 0x4aa   :  { %v1118_v1 = vadd.f32 %v1511_v41, %v1117_v43 }
 0x4ac   :  { %v1123_v61 = vmax.f32 %v1118_v1, 0.0 }
 0x4ae   :  { %1426 = vmatmul.msk.f32.gmra.mxu2 %vm212_vm12, %v1123_v61 }
 0x519   :  { %v1167_v42 = vpop.f32.mrf.mxu2 }
 0x51a   :  { %v1168_v45 = vadd.f32 %v1512_v62, %v1167_v42 }
 0x51c   :  { %v1183_v8 = vsel %vm326_vm6, %v1168_v45, 0.0 }
 0x51d   :  { %1184 = vadd.xlane.f32.xlu0 %v1183_v8 }
 0x521   :  { %v1170_v3 = vpop.f32.mrf.mxu2 }
 0x522   :  { %v1171_v19 = vadd.f32 %v1512_v62, %v1170_v3 }
 0x524   :  { %v1186_v4 = vsel %vm326_vm6, %v1171_v19, 0.0 }
 0x525   :  { %1187 = vadd.xlane.f32.xlu0 %v1186_v4 }
 0x529   :  { %v1173_v5 = vpop.f32.mrf.mxu2 }
 0x52a   :  { %v1174_v6 = vadd.f32 %v1512_v62, %v1173_v5 }
 0x52c   :  { %v1189_v18 = vsel %vm326_vm6, %v1174_v6, 0.0 }
 0x52d   :  { %1190 = vadd.xlane.f32.xlu1 %v1189_v18 }
 0x531   :  { %v1176_v7 = vpop.f32.mrf.mxu2 }
 0x532   :  { %v1177_v9 = vadd.f32 %v1512_v62, %v1176_v7 }
 0x534   :  { %v1192_v10 = vsel %vm326_vm6, %v1177_v9, 0.0 }
 0x535   :  { %1193 = vadd.xlane.f32.xlu1 %v1192_v10 }
 0x590   :  { %v1185_v11 = vpop.xlane.xlu0 %1184 }
 0x591   :  { %v1195_v13 = vmul.f32 %v1185_v11, %v2102_v24 }
 0x593   :  { %v1199_v60 = vsub.f32 %v1168_v45, %v1195_v13 }
 0x595   :  { %v1203_v14 = vmul.f32 %v1199_v60, %v1199_v60 }
 0x597   :  { %v1207_v47 = vsel %vm326_vm6, %v1203_v14, 0.0 }
 0x598   :  { %1208 = vadd.xlane.f32.xlu2 %v1207_v47  ;;  %v1188_v15 = vpop.xlane.xlu0 %1187 }
 0x599   :  { %v1196_v44 = vmul.f32 %v1188_v15, %v2102_v24 }
 0x59b   :  { %v1200_v16 = vsub.f32 %v1171_v19, %v1196_v44 }
 0x59d   :  { %v1204_v17 = vmul.f32 %v1200_v16, %v1200_v16 }
 0x59f   :  { %v1210_v20 = vsel %vm326_vm6, %v1204_v17, 0.0 }
 0x5a0   :  { %v1191_v34 = vpop.xlane.xlu1 %1190  ;;  %1211 = vadd.xlane.f32.xlu2 %v1210_v20 }
 0x5a1   :  { %v1197_v21 = vmul.f32 %v1191_v34, %v2102_v24 }
 0x5a3   :  { %v2330_v22 = vsub.f32 %v1174_v6, %v1197_v21 }
 0x5a5   :  { %v1205_v27 = vmul.f32 %v2330_v22, %v2330_v22 }
 0x5a7   :  { %v1213_v29 = vsel %vm326_vm6, %v1205_v27, 0.0 }
 0x5a8   :  { %v1194_v30 = vpop.xlane.xlu1 %1193  ;;  %1214 = vadd.xlane.f32.xlu0 %v1213_v29 }
 0x5a9   :  { %v1198_v31 = vmul.f32 %v1194_v30, %v2102_v24 }
 0x5ab   :  { %v2336_v26 = vsub.f32 %v1177_v9, %v1198_v31 }
 0x5ad   :  { %v1206_v28 = vmul.f32 %v2336_v26, %v2336_v26 }
 0x5af   :  { %v1216_v38 = vsel %vm326_vm6, %v1206_v28, 0.0 }
 0x5b0   :  { %1217 = vadd.xlane.f32.xlu1 %v1216_v38 }
 0x60b   :  { %v1209_v33 = vpop.xlane.xlu2 %1208 }
 0x60c   :  { %v1219_v25 = vmul.f32 %v1209_v33, %v2102_v24 }
 0x60e   :  { %v1223_v40 = vadd.f32 1e-05, %v1219_v25 }
 0x610   :  { %1515 = vrsqrt.f32 %v1223_v40  ;;  %vm1233_vm12 = vweird.f32 %v1223_v40 }
 0x613   :  { %v1212_v54 = vpop.xlane.xlu2 %1211 }
 0x614   :  { %v1220_v56 = vmul.f32 %v1212_v54, %v2102_v24 }
 0x616   :  { %v1516_v39 = vpop.eup %1515  ;;  %v1224_v46 = vadd.f32 1e-05, %v1220_v56 }
 0x617   :  { %v1228_v36 = vmul.f32 %v1516_v39, %v1223_v40  ;;  %vm1234_vm6 = vweird.f32 %v1516_v39 }
 0x618   :  { %1517 = vrsqrt.f32 %v1224_v46  ;;  %vm1235_vm5 = vmor %vm1233_vm12, %vm1234_vm6  ;;  %vm1243_vm14 = vweird.f32 %v1224_v46  ;;  %vm1317_vm6 = vcmask 785920  }
 0x619   :  { %v1229_v48 = vmul.f32 %v1516_v39, %v1228_v36 }
 0x61b   :  { %v1230_v49 = vmul.f32 0.5, %v1229_v48  ;;  %v1215_v52 = vpop.xlane.xlu0 %1214 }
 0x61c   :  { %v1221_v53 = vmul.f32 %v1215_v52, %v2102_v24 }
 0x61d   :  { %v1231_v55 = vsub.f32 1.5, %v1230_v49 }
 0x61e   :  { %v1518_v41 = vpop.eup %1517  ;;  %v1225_v37 = vadd.f32 1e-05, %v1221_v53 }
 0x61f   :  { %v1232_v50 = vmul.f32 %v1516_v39, %v1231_v55  ;;  %v1238_v23 = vmul.f32 %v1518_v41, %v1224_v46  ;;  %vm1244_vm13 = vweird.f32 %v1518_v41 }
 0x620   :  { %1519 = vrsqrt.f32 %v1225_v37  ;;  %vm1245_vm15 = vmor %vm1243_vm14, %vm1244_vm13  ;;  %vm1253_vm3 = vweird.f32 %v1225_v37 }
 0x621   :  { %v1236_v57 = vsel %vm1235_vm5, %v1516_v39, %v1232_v50  ;;  %v1239_v35 = vmul.f32 %v1518_v41, %v1238_v23 }
 0x622   :  { %v1267_v58 = vmul.f32 %v1236_v57, %v1199_v60 }
 0x623   :  { %v1240_v63 = vmul.f32 0.5, %v1239_v35  ;;  %v1218_v43 = vpop.xlane.xlu1 %1217 }
 0x624   :  { %v1222_v1 = vmul.f32 %v1218_v43, %v2102_v24  ;;  %v1274_v61 = vmul.f32 %v1513_v0, %v1267_v58 }
 0x625   :  { %v1241_v62 = vsub.f32 1.5, %v1240_v63 }
 0x626   :  { %v1520_v42 = vpop.eup %1519  ;;  %v1226_v45 = vadd.f32 1e-05, %v1222_v1  ;;  %v1281_v8 = vadd.f32 %v1514_v59, %v1274_v61 }
 0x627   :  { %v1242_v3 = vmul.f32 %v1518_v41, %v1241_v62  ;;  %v1248_v19 = vmul.f32 %v1520_v42, %v1225_v37  ;;  %vm1254_vm2 = vweird.f32 %v1520_v42 }
 0x628   :  { %1521 = vrsqrt.f32 %v1226_v45  ;;  %vm1285_vm0 = vcmp.gt.f32.partialorder %v1281_v8, 0.0  ;;  %v1289_v4 = vmul.f32 0.1, %v1281_v8  ;;  %vm1255_vm4 = vmor %vm1253_vm3, %vm1254_vm2  ;;  %vm1263_vm8 = vweird.f32 %v1226_v45 }
 0x629   :  { %v1246_v5 = vsel %vm1245_vm15, %v1518_v41, %v1242_v3  ;;  %v1249_v6 = vmul.f32 %v1520_v42, %v1248_v19 }
 0x62a   :  { %v1268_v18 = vmul.f32 %v1246_v5, %v1200_v16  ;;  %v1293_v7 = vsel %vm1285_vm0, %v1281_v8, %v1289_v4 }
 0x62b   :  { %v1250_v9 = vmul.f32 0.5, %v1249_v6  ;;  %v1297_v24 = vadd.f32 %v1293_v7, %v2203_v12 }
 0x62c   :  { %v1275_v10 = vmul.f32 %v1513_v0, %v1268_v18 }
 0x62d   :  { %v1251_v11 = vsub.f32 1.5, %v1250_v9  ;;  %1305 = vrot.lane.b32.xlu2 %v1297_v24, %s1613_s16 }
 0x62e   :  { %v1522_v13 = vpop.eup %1521  ;;  %v1282_v60 = vadd.f32 %v1514_v59, %v1275_v10 }
 0x62f   :  { %v1252_v14 = vmul.f32 %v1520_v42, %v1251_v11  ;;  %v1258_v47 = vmul.f32 %v1522_v13, %v1226_v45  ;;  %vm1264_vm1 = vweird.f32 %v1522_v13 }
 0x630   :  { %vm1286_vm7 = vcmp.gt.f32.partialorder %v1282_v60, 0.0  ;;  %v1290_v15 = vmul.f32 0.1, %v1282_v60  ;;  %vm1265_vm9 = vmor %vm1263_vm8, %vm1264_vm1 }
 0x631   :  { %v1256_v44 = vsel %vm1255_vm4, %v1520_v42, %v1252_v14  ;;  %v1259_v16 = vmul.f32 %v1522_v13, %v1258_v47 }
 0x632   :  { %v1269_v17 = vmul.f32 %v1256_v44, %v2330_v22  ;;  %v1294_v20 = vsel %vm1286_vm7, %v1282_v60, %v1290_v15 }
 0x633   :  { %v1260_v12 = vmul.f32 0.5, %v1259_v16  ;;  %v1298_v34 = vadd.f32 %v1294_v20, %v2221_v32 }
 0x634   :  { %v1276_v21 = vmul.f32 %v1513_v0, %v1269_v17 }
 0x635   :  { %v1261_v27 = vsub.f32 1.5, %v1260_v12  ;;  %1307 = vrot.lane.b32.xlu0 %v1298_v34, %s1613_s16 }
 0x636   :  { %v1283_v29 = vadd.f32 %v1514_v59, %v1276_v21 }
 0x637   :  { %v1262_v30 = vmul.f32 %v1522_v13, %v1261_v27 }
 0x638   :  { %vm1287_vm10 = vcmp.gt.f32.partialorder %v1283_v29, 0.0  ;;  %v1291_v31 = vmul.f32 0.1, %v1283_v29 }
 0x639   :  { %v1266_v28 = vsel %vm1265_vm9, %v1522_v13, %v1262_v30 }
 0x63a   :  { %v1270_v38 = vmul.f32 %v1266_v28, %v2336_v26  ;;  %v1295_v33 = vsel %vm1287_vm10, %v1283_v29, %v1291_v31 }
 0x63b   :  { %v1299_v22 = vadd.f32 %v1295_v33, %v2238_v51 }
 0x63c   :  { %v1277_v25 = vmul.f32 %v1513_v0, %v1270_v38 }
 0x63d   :  { %1309 = vrot.lane.b32.xlu1 %v1299_v22, %s1613_s16 }
 0x63e   :  { %v1284_v32 = vadd.f32 %v1514_v59, %v1277_v25 }
 0x640   :  { %vm1288_vm11 = vcmp.gt.f32.partialorder %v1284_v32, 0.0  ;;  %v1292_v40 = vmul.f32 0.1, %v1284_v32 }
 0x642   :  { %v1296_v54 = vsel %vm1288_vm11, %v1284_v32, %v1292_v40 }
 0x643   :  { %v1300_v56 = vadd.f32 %v1296_v54, %v2252_v2 }
 0x645   :  { %1311 = vrot.lane.b32.xlu2 %v1300_v56, %s1613_s16 }
 0x687   :  { %v1306_v39 = vpop.permute.xlu2 %1305 }
 0x688   :  { %1318 = vst.msk [vmem:[#allocation11] sm:$0xff] %vm1317_vm6, %v1306_v39 }
 0x69f   :  { %v1312_v46 = vpop.permute.xlu2 %1311 }
 0x6a0   :  { %1321 = vst.msk [vmem:[#allocation11 + $0x18] sm:$0xff] %vm1317_vm6, %v1312_v46 }
 0x6a7   :  { %v1308_v26 = vpop.permute.xlu0 %1307 }
 0x6a8   :  { %1319 = vst.msk [vmem:[#allocation11 + $0x8] sm:$0xff] %vm1317_vm6, %v1308_v26 }
 0x6af   :  { %v1310_v51 = vpop.permute.xlu1 %1309 }
 0x6b0   :  { %1320 = vst.msk [vmem:[#allocation11 + $0x10] sm:$0xff] %vm1317_vm6, %v1310_v51 }
 0x6b1   :  { %1334 = dma.vmem_to_hbm [thread:$0]  %s1327_s6, 512, %s1329_s18, [#allocation6], %s1615_s27, %s1615_s27, %s1616_s21  }
 0x6b2   :  { %1595 = dma.done.wait [#allocation6], 512  }
 0x6b3   :  { %1596 = vsyncadd [#allocation6], 4294966784 }
 0x6b4   :  { %1339 = vsyncpa [#allocation6], 1 }
 0x6b5   :  { %1340 = vsyncpa [#allocation7], 1 }
 0x6b6   :  { %1341 = vsyncpa [#allocation9], 1 }

</bundles_post_ra>
